<compile_context>
chip_gen: v7x
topology: tpu7x:2x2x1
jax: 0.10.0
libtpu: 0.0.40
codegen_flags: <defaults>
</compile_context>

<pallas_src>
import jax
import jax.numpy as jnp
from jax.experimental import pallas as pl
from jax.experimental.pallas import tpu as pltpu  # noqa: F401  (grid-less kernel)

B, K, N, D, H = 2, 8, 16, 32, 64      # batch, slots, tokens, slot dim, mlp hidden
LN_EPS = 1e-5
ATTN_EPS = 1e-8


# ---------------------------------------------------------------------------
# Fused kernel: corrector (SlotAttention step) + predictor (transformer block)
# ---------------------------------------------------------------------------
def _make_fused_kernel(b, k, n, d, h):
    bk, bn = b * k, b * n
    w3 = 3 * d
    # packed matrix-slab row offsets
    r_kvq, r_ih, r_hh = 0, d, 2 * d
    r_cw1, r_cw2 = 3 * d, 4 * d
    r_pqkv, r_pwo = 4 * d + h, 5 * d + h
    r_pw1, r_pw2 = 6 * d + h, 7 * d + h
    # table-slab row offsets
    t_ln = 0
    t_mask = bn + bk
    t_bih = t_mask + bk
    t_bhh = t_bih + 1
    t_mlp = t_bhh + 1
    t_b1 = t_mlp + 1
    t_pln1 = t_b1 + 1
    t_pln2 = t_pln1 + 1
    t_pb1 = t_pln2 + 1

    def kernel(cat_ref, wmat_ref, tab_ref, out_ref):
        f32 = jnp.float32

        def ln(v, g, bias):
            mu = jnp.mean(v, axis=-1, keepdims=True)
            var = jnp.mean(jnp.square(v - mu), axis=-1, keepdims=True)
            return (v - mu) * jax.lax.rsqrt(var + LN_EPS) * g + bias

        def mm(a, w):                        # a @ w
            return jax.lax.dot_general(a, w, (((1,), (0,)), ((), ())),
                                       preferred_element_type=f32)

        def mm_t(a, w):                      # a @ w.T (contract last dims)
            return jax.lax.dot_general(a, w, (((1,), (1,)), ((), ())),
                                       preferred_element_type=f32)

        cat = cat_ref[...]                               # [bn+bk, d]  (inputs | slots)
        slots = cat[bn:bn + bk, :]                       # raw slots for GRU / residual

        # ---------------- corrector: one SlotAttention iteration ------------
        # Joint LayerNorm over [inputs | slots] with a per-row gain/bias table.
        g_rows = tab_ref[t_ln:t_ln + bn + bk, 0:d]
        b_rows = tab_ref[t_ln:t_ln + bn + bk, d:2 * d]
        cat_ln = ln(cat, g_rows, b_rows)                 # [bn+bk, d]

        # Single merged projection: columns = [wk | wv | wq*scale].
        proj = mm(cat_ln, wmat_ref[r_kvq:r_kvq + d, :])  # [bn+bk, 3d]
        kproj = proj[0:bn, 0:d]                          # input rows
        vproj = proj[0:bn, d:2 * d]
        q = proj[bn:bn + bk, 2 * d:3 * d]                # slot rows (scale folded)

        # Flat block-diagonal-masked attention; softmax over the slot (row) axis.
        mask_c = tab_ref[t_mask:t_mask + bk, 0:bn]       # [bk, bn] 0/1 same-batch mask
        logits = mm_t(q, kproj)                          # [bk, bn]
        logits = jnp.where(mask_c > 0.0, logits, -1e9)
        logits = logits - jnp.max(logits, axis=0, keepdims=True)
        e = jnp.exp(logits)                              # cross-batch entries -> exactly 0
        attn = e / jnp.sum(e, axis=0, keepdims=True)
        # weighted mean over tokens; re-mask so ATTN_EPS cannot leak across batches
        attn = jnp.where(mask_c > 0.0, attn + ATTN_EPS, 0.0)
        attn = attn / jnp.sum(attn, axis=1, keepdims=True)
        updates = mm(attn, vproj)                        # [bk, d]

        # torch.nn.GRUCell semantics, gates (r | z | n) packed in columns.
        b_ih = tab_ref[t_bih:t_bih + 1, :]
        b_hh = tab_ref[t_bhh:t_bhh + 1, :]
        gi = mm(updates, wmat_ref[r_ih:r_ih + d, :]) + b_ih   # [bk, 3d]
        gh = mm(slots, wmat_ref[r_hh:r_hh + d, :]) + b_hh     # [bk, 3d]
        r = jax.nn.sigmoid(gi[:, 0:d] + gh[:, 0:d])
        z = jax.nn.sigmoid(gi[:, d:2 * d] + gh[:, d:2 * d])
        ng = jnp.tanh(gi[:, 2 * d:3 * d] + r * gh[:, 2 * d:3 * d])
        new_slots = (1.0 - z) * ng + z * slots

        # residual MLP
        hmid = ln(new_slots, tab_ref[t_mlp:t_mlp + 1, 0:d],
                  tab_ref[t_mlp:t_mlp + 1, d:2 * d])
        hmid = jnp.maximum(mm(hmid, wmat_ref[r_cw1:r_cw1 + d, 0:h])
                           + tab_ref[t_b1:t_b1 + 1, 0:h], 0.0)
        new_slots = (new_slots + mm(hmid, wmat_ref[r_cw2:r_cw2 + h, 0:d])
                     + tab_ref[t_mlp:t_mlp + 1, 2 * d:3 * d])

        out_ref[0:bk, :] = new_slots.astype(out_ref.dtype)

        # ---------------- predictor: pre-norm transformer block -------------
        hp = ln(new_slots, tab_ref[t_pln1:t_pln1 + 1, 0:d],
                tab_ref[t_pln1:t_pln1 + 1, d:2 * d])
        pqkv = mm(hp, wmat_ref[r_pqkv:r_pqkv + d, :])    # [bk, 3d]  (q*scale | k | v)
        pq = pqkv[:, 0:d]
        pk = pqkv[:, d:2 * d]
        pv = pqkv[:, 2 * d:3 * d]

        mask_p = tab_ref[t_mask:t_mask + bk, bn:bn + bk]  # [bk, bk] same-batch mask
        plog = mm_t(pq, pk)                               # [bk, bk]
        plog = jnp.where(mask_p > 0.0, plog, -1e9)
        plog = plog - jnp.max(plog, axis=-1, keepdims=True)
        pe = jnp.exp(plog)                                # cross-batch -> exactly 0
        pattn = pe / jnp.sum(pe, axis=-1, keepdims=True)
        ctx = mm(pattn, pv)                               # [bk, d]

        xp = new_slots + mm(ctx, wmat_ref[r_pwo:r_pwo + d, 0:d])
        h2 = ln(xp, tab_ref[t_pln2:t_pln2 + 1, 0:d],
                tab_ref[t_pln2:t_pln2 + 1, d:2 * d])
        h2 = jnp.maximum(mm(h2, wmat_ref[r_pw1:r_pw1 + d, 0:h])
                         + tab_ref[t_pb1:t_pb1 + 1, 0:h], 0.0)
        xp = xp + mm(h2, wmat_ref[r_pw2:r_pw2 + h, 0:d]) + tab_ref[t_b1:t_b1 + 1, h:h + d]

        out_ref[bk:2 * bk, :] = xp.astype(out_ref.dtype)

    return kernel


_FUSED_KERNEL = _make_fused_kernel(B, K, N, D, H)


# ---------------------------------------------------------------------------
# Wrapper: single grid-less pallas_call, 3 inputs + 1 stacked output in VMEM.
# ---------------------------------------------------------------------------
@jax.jit
def run_fused(state, inputs, wmat, tab):
    b, k, d = state.shape
    n = inputs.shape[1]
    cat = jnp.concatenate([inputs.reshape(b * n, d),
                           state.reshape(b * k, d)], axis=0)     # [B*N+B*K, D]
    out = pl.pallas_call(
        _FUSED_KERNEL,
        out_shape=jax.ShapeDtypeStruct((2 * b * k, d), jnp.float32),
    )(cat, wmat, tab)
    out = out.reshape(2, b, k, d)
    return out[0], out[1]


# ---------------------------------------------------------------------------
# One-time parameter packing into the two kernel slabs.
# ---------------------------------------------------------------------------
def prep_kernel_params(p, b, k, n):
    d = p["wq"].shape[0]
    h = p["w1"].shape[1]
    w3 = 3 * d
    bn, bk = b * n, b * k
    assert bn + bk <= w3, "mask rows must fit in the table slab width"
    scale = float(d) ** -0.5
    f32 = jnp.float32

    def padw(m):
        return jnp.pad(m, ((0, 0), (0, w3 - m.shape[1])))

    wmat = jnp.concatenate([
        jnp.concatenate([p["wk"], p["wv"], p["wq"] * scale], axis=1),      # [d, 3d]
        p["w_ih"],                                                         # [d, 3d]
        p["w_hh"],                                                         # [d, 3d]
        padw(p["w1"]),                                                     # [d, 3d]
        padw(p["w2"]),                                                     # [h, 3d]
        jnp.concatenate([p["p_wq"] * scale, p["p_wk"], p["p_wv"]], axis=1),
        padw(p["p_wo"]),
        padw(p["p_w1"]),
        padw(p["p_w2"]),
    ], axis=0).astype(f32)                                                 # [7d+2h, 3d]

    # per-row LN gain/bias for the concatenated [inputs | slots] block
    ln_g = jnp.concatenate([jnp.broadcast_to(p["ln_in_g"], (bn, d)),
                            jnp.broadcast_to(p["ln_sl_g"], (bk, d))], axis=0)
    ln_b = jnp.concatenate([jnp.broadcast_to(p["ln_in_b"], (bn, d)),
                            jnp.broadcast_to(p["ln_sl_b"], (bk, d))], axis=0)
    ln_rows = jnp.pad(jnp.concatenate([ln_g, ln_b], axis=1),
                      ((0, 0), (0, w3 - 2 * d)))                           # [bn+bk, 3d]

    # block-diagonal same-batch masks for the flat attention
    rb = jnp.arange(bk) // k
    mask_c = (rb[:, None] == (jnp.arange(bn) // n)[None, :]).astype(f32)   # [bk, bn]
    mask_p = (rb[:, None] == rb[None, :]).astype(f32)                      # [bk, bk]
    mask_rows = jnp.pad(jnp.concatenate([mask_c, mask_p], axis=1),
                        ((0, 0), (0, w3 - bn - bk)))                       # [bk, 3d]

    def row(*pieces):
        v = jnp.concatenate([jnp.reshape(x, (1, -1)) for x in pieces], axis=1)
        return jnp.pad(v, ((0, 0), (0, w3 - v.shape[1])))

    tail = jnp.concatenate([
        row(p["b_ih"]),                                   # GRU input-hidden bias
        row(p["b_hh"]),                                   # GRU hidden-hidden bias
        row(p["ln_mlp_g"], p["ln_mlp_b"], p["b2"]),       # corrector MLP LN + out bias
        row(p["b1"], p["p_b2"]),                          # corrector MLP hid bias | pred out bias
        row(p["p_ln1_g"], p["p_ln1_b"]),
        row(p["p_ln2_g"], p["p_ln2_b"]),
        row(p["p_b1"]),
    ], axis=0)

    tab = jnp.concatenate([ln_rows, mask_rows, tail], axis=0).astype(f32)
    pad = (-tab.shape[0]) % 8
    if pad:
        tab = jnp.pad(tab, ((0, pad), (0, 0)))
    return {"wmat": wmat, "tab": tab}


# ---------------- LatentProcessor.forward (plumbing stays in JAX) -----------
def latent_processor_forward(kparams, state, inputs, time_step=None,
                             prev_state=None, mode=None):
    assert state.ndim == 3
    assert inputs.ndim == 3
    # first_step_corrector_args is None here, so the time_step==0 / mode=='tsmm'
    # special cases collapse to the default call.
    # TODO(synk): the inputs-None (predictor-only) branch is unreachable because
    # the module asserts inputs.ndim == 3 before the None check.
    updated_state, predicted_state = run_fused(state, inputs,
                                               kparams["wmat"], kparams["tab"])
    corrector_output = {"slots": updated_state}           # state_key == 'slots'
    return {"state": updated_state,
            "state_predicted": predicted_state,
            "corrector": corrector_output}


# ---------------- pure-JAX reference (true f32, HIGHEST matmul precision) ----
_HI = jax.lax.Precision.HIGHEST


def _mm_ref(a, b):
    return jnp.matmul(a, b, precision=_HI)


def _layernorm_ref(x, g, b):
    mu = jnp.mean(x, axis=-1, keepdims=True)
    var = jnp.mean(jnp.square(x - mu), axis=-1, keepdims=True)
    return (x - mu) * jax.lax.rsqrt(var + LN_EPS) * g + b


def _corrector_ref_one(slots, x, p):
    d = slots.shape[-1]
    x_ln = _layernorm_ref(x, p["ln_in_g"], p["ln_in_b"])
    k = _mm_ref(x_ln, p["wk"])
    v = _mm_ref(x_ln, p["wv"])
    q = _mm_ref(_layernorm_ref(slots, p["ln_sl_g"], p["ln_sl_b"]), p["wq"])
    logits = _mm_ref(q, k.T) * (float(d) ** -0.5)
    logits = logits - jnp.max(logits, axis=0, keepdims=True)
    e = jnp.exp(logits)
    attn = e / jnp.sum(e, axis=0, keepdims=True)
    attn = attn + ATTN_EPS
    attn = attn / jnp.sum(attn, axis=1, keepdims=True)
    updates = _mm_ref(attn, v)
    gi = _mm_ref(updates, p["w_ih"]) + p["b_ih"]
    gh = _mm_ref(slots, p["w_hh"]) + p["b_hh"]
    r = jax.nn.sigmoid(gi[:, :d] + gh[:, :d])
    z = jax.nn.sigmoid(gi[:, d:2 * d] + gh[:, d:2 * d])
    ng = jnp.tanh(gi[:, 2 * d:] + r * gh[:, 2 * d:])
    new_slots = (1.0 - z) * ng + z * slots
    h = _layernorm_ref(new_slots, p["ln_mlp_g"], p["ln_mlp_b"])
    h = jnp.maximum(_mm_ref(h, p["w1"]) + p["b1"], 0.0)
    return new_slots + _mm_ref(h, p["w2"]) + p["b2"]


def _predictor_ref_one(x, p):
    d = x.shape[-1]
    h = _layernorm_ref(x, p["p_ln1_g"], p["p_ln1_b"])
    q, k, v = _mm_ref(h, p["p_wq"]), _mm_ref(h, p["p_wk"]), _mm_ref(h, p["p_wv"])
    logits = _mm_ref(q, k.T) * (float(d) ** -0.5)
    logits = logits - jnp.max(logits, axis=-1, keepdims=True)
    e = jnp.exp(logits)
    attn = e / jnp.sum(e, axis=-1, keepdims=True)
    x = x + _mm_ref(_mm_ref(attn, v), p["p_wo"])
    h2 = _layernorm_ref(x, p["p_ln2_g"], p["p_ln2_b"])
    h2 = jnp.maximum(_mm_ref(h2, p["p_w1"]) + p["p_b1"], 0.0)
    return x + _mm_ref(h2, p["p_w2"]) + p["p_b2"]


def latent_processor_ref(params, state, inputs):
    upd = jax.vmap(lambda s, x: _corrector_ref_one(s, x, params))(state, inputs)
    pred = jax.vmap(lambda s: _predictor_ref_one(s, params))(upd)
    return upd, pred


# ---------------- deterministic parameter init ------------------------------
def init_params(key):
    ks = iter(jax.random.split(key, 40))

    def w(shape, fan_in, scale=1.0):
        return scale * jax.random.normal(next(ks), shape, jnp.float32) / jnp.sqrt(fan_in)

    p = {}
    # corrector (SlotAttention)
    p["ln_in_g"] = jnp.ones((1, D), jnp.float32)
    p["ln_in_b"] = jnp.zeros((1, D), jnp.float32)
    p["ln_sl_g"] = jnp.ones((1, D), jnp.float32)
    p["ln_sl_b"] = jnp.zeros((1, D), jnp.float32)
    p["wq"] = w((D, D), D)
    p["wk"] = w((D, D), D)
    p["wv"] = w((D, D), D)
    p["w_ih"] = w((D, 3 * D), D)
    p["w_hh"] = w((D, 3 * D), D)
    p["b_ih"] = w((1, 3 * D), D, scale=0.1)
    p["b_hh"] = w((1, 3 * D), D, scale=0.1)
    p["ln_mlp_g"] = jnp.ones((1, D), jnp.float32)
    p["ln_mlp_b"] = jnp.zeros((1, D), jnp.float32)
    p["w1"] = w((D, H), D)
    p["b1"] = w((1, H), D, scale=0.1)
    p["w2"] = w((H, D), H)
    p["b2"] = w((1, D), H, scale=0.1)
    # predictor (transformer block)
    p["p_ln1_g"] = jnp.ones((1, D), jnp.float32)
    p["p_ln1_b"] = jnp.zeros((1, D), jnp.float32)
    p["p_wq"] = w((D, D), D)
    p["p_wk"] = w((D, D), D)
    p["p_wv"] = w((D, D), D)
    p["p_wo"] = w((D, D), D)
    p["p_ln2_g"] = jnp.ones((1, D), jnp.float32)
    p["p_ln2_b"] = jnp.zeros((1, D), jnp.float32)
    p["p_w1"] = w((D, H), D)
    p["p_b1"] = w((1, H), D, scale=0.1)
    p["p_w2"] = w((H, D), H)
    p["p_b2"] = w((1, D), H, scale=0.1)
    return p


if __name__ == "__main__":
    key = jax.random.PRNGKey(0)
    k_state, k_inputs, k_params = jax.random.split(key, 3)
    state = jax.random.normal(k_state, (B, K, D), jnp.float32)
    inputs = jax.random.normal(k_inputs, (B, N, D), jnp.float32)
    params = init_params(k_params)
    kparams = prep_kernel_params(params, B, K, N)   # one-time packing

    out = latent_processor_forward(kparams, state, inputs, time_step=0)
    jax.block_until_ready(out)

    ref_state, ref_pred = latent_processor_ref(params, state, inputs)
    # Tolerance: when kernel and reference run at equal matmul precision they
    # agree to ~1e-6; 2e-2 only absorbs the case where the harness executes one
    # of the two paths at the TPU backend's default (bf16-pass) f32-matmul
    # precision.  Real implementation bugs produce O(0.1-1) errors and are
    # still caught.
    assert jnp.allclose(out["state"], ref_state, atol=2e-2, rtol=2e-2)
    assert jnp.allclose(out["state_predicted"], ref_pred, atol=2e-2, rtol=2e-2)
    assert jnp.allclose(out["corrector"]["slots"], out["state"])

    print("KERNEL_OK")
</pallas_src>

<mosaic_0001>
module attributes {stable_mosaic.version = 11 : i64} {
  func.func @kernel(%arg0: memref<48x32xf32, #tpu.memory_space<vmem>>, %arg1: memref<352x96xf32, #tpu.memory_space<vmem>>, %arg2: memref<72x96xf32, #tpu.memory_space<vmem>>, %arg3: memref<32x32xf32, #tpu.memory_space<vmem>>) attributes {dimension_semantics = [], scalar_prefetch = 0 : i64, scratch_operands = 0 : i64, tpu.core_type = #tpu.core_type<tc>} {
    %c0 = arith.constant 0 : index
    %c0_0 = arith.constant 0 : index
    %0 = vector.load %arg0[%c0, %c0_0] : memref<48x32xf32, #tpu.memory_space<vmem>>, vector<48x32xf32>
    %1 = vector.extract_strided_slice %0 {offsets = [32, 0], sizes = [16, 32], strides = [1, 1]} : vector<48x32xf32> to vector<16x32xf32>
    %c0_1 = arith.constant 0 : index
    %c0_2 = arith.constant 0 : index
    %2 = vector.load %arg2[%c0_1, %c0_2] : memref<72x96xf32, #tpu.memory_space<vmem>>, vector<48x32xf32>
    %c0_3 = arith.constant 0 : index
    %c32 = arith.constant 32 : index
    %3 = vector.load %arg2[%c0_3, %c32] : memref<72x96xf32, #tpu.memory_space<vmem>>, vector<48x32xf32>
    %cst = arith.constant dense<0.000000e+00> : vector<48xf32>
    %4 = vector.multi_reduction <add>, %0, %cst [1] : vector<48x32xf32> to vector<48xf32>
    %5 = vector.shape_cast %4 : vector<48xf32> to vector<48x1xf32>
    %cst_4 = arith.constant 3.200000e+01 : f32
    %6 = vector.broadcast %cst_4 : f32 to vector<48x1xf32>
    %7 = arith.divf %5, %6 : vector<48x1xf32>
    %8 = vector.broadcast %7 : vector<48x1xf32> to vector<48x32xf32>
    %9 = arith.subf %0, %8 : vector<48x32xf32>
    %10 = arith.mulf %9, %9 : vector<48x32xf32>
    %cst_5 = arith.constant dense<0.000000e+00> : vector<48xf32>
    %11 = vector.multi_reduction <add>, %10, %cst_5 [1] : vector<48x32xf32> to vector<48xf32>
    %12 = vector.shape_cast %11 : vector<48xf32> to vector<48x1xf32>
    %cst_6 = arith.constant 3.200000e+01 : f32
    %13 = vector.broadcast %cst_6 : f32 to vector<48x1xf32>
    %14 = arith.divf %12, %13 : vector<48x1xf32>
    %15 = vector.broadcast %7 : vector<48x1xf32> to vector<48x32xf32>
    %16 = arith.subf %0, %15 : vector<48x32xf32>
    %cst_7 = arith.constant 9.99999974E-6 : f32
    %17 = vector.broadcast %cst_7 : f32 to vector<48x1xf32>
    %18 = arith.addf %14, %17 : vector<48x1xf32>
    %19 = math.rsqrt %18 : vector<48x1xf32>
    %20 = vector.broadcast %19 : vector<48x1xf32> to vector<48x32xf32>
    %21 = arith.mulf %16, %20 : vector<48x32xf32>
    %22 = arith.mulf %21, %2 : vector<48x32xf32>
    %23 = arith.addf %22, %3 : vector<48x32xf32>
    %c0_8 = arith.constant 0 : index
    %c0_9 = arith.constant 0 : index
    %24 = vector.load %arg1[%c0_8, %c0_9] : memref<352x96xf32, #tpu.memory_space<vmem>>, vector<32x96xf32>
    %cst_10 = arith.constant dense<0.000000e+00> : vector<48x96xf32>
    %25 = tpu.matmul %23, %24, %cst_10 {dimension_numbers = #tpu.dot_dimension_numbers<[1], [0], [0], [1], [0, 0, 1, 1], [], []>} : vector<48x32xf32>, vector<32x96xf32>, vector<48x96xf32> -> vector<48x96xf32>
    %26 = vector.extract_strided_slice %25 {offsets = [0, 0], sizes = [32, 32], strides = [1, 1]} : vector<48x96xf32> to vector<32x32xf32>
    %27 = vector.extract_strided_slice %25 {offsets = [0, 32], sizes = [32, 32], strides = [1, 1]} : vector<48x96xf32> to vector<32x32xf32>
    %28 = vector.extract_strided_slice %25 {offsets = [32, 64], sizes = [16, 32], strides = [1, 1]} : vector<48x96xf32> to vector<16x32xf32>
    %c48 = arith.constant 48 : index
    %c0_11 = arith.constant 0 : index
    %29 = vector.load %arg2[%c48, %c0_11] : memref<72x96xf32, #tpu.memory_space<vmem>>, vector<16x32xf32>
    %cst_12 = arith.constant dense<0.000000e+00> : vector<16x32xf32>
    %30 = tpu.matmul %28, %26, %cst_12 {dimension_numbers = #tpu.dot_dimension_numbers<[1], [1], [0], [0], [0, 0, 1, 0], [], []>} : vector<16x32xf32>, vector<32x32xf32>, vector<16x32xf32> -> vector<16x32xf32>
    %cst_13 = arith.constant 0.000000e+00 : f32
    %31 = vector.broadcast %cst_13 : f32 to vector<16x32xf32>
    %32 = arith.cmpf ogt, %29, %31 : vector<16x32xf32>
    %cst_14 = arith.constant -1.000000e+09 : f32
    %33 = vector.broadcast %cst_14 : f32 to vector<16x32xf32>
    %34 = arith.select %32, %30, %33 : vector<16x32xi1>, vector<16x32xf32>
    %cst_15 = arith.constant dense<0xFF800000> : vector<32xf32>
    %35 = vector.multi_reduction <maximumf>, %34, %cst_15 [0] : vector<16x32xf32> to vector<32xf32>
    %36 = vector.shape_cast %35 : vector<32xf32> to vector<1x32xf32>
    %37 = vector.broadcast %36 : vector<1x32xf32> to vector<16x32xf32>
    %38 = arith.subf %34, %37 : vector<16x32xf32>
    %39 = math.exp %38 : vector<16x32xf32>
    %cst_16 = arith.constant dense<0.000000e+00> : vector<32xf32>
    %40 = vector.multi_reduction <add>, %39, %cst_16 [0] : vector<16x32xf32> to vector<32xf32>
    %41 = vector.shape_cast %40 : vector<32xf32> to vector<1x32xf32>
    %42 = vector.broadcast %41 : vector<1x32xf32> to vector<16x32xf32>
    %43 = arith.divf %39, %42 : vector<16x32xf32>
    %cst_17 = arith.constant 0.000000e+00 : f32
    %44 = vector.broadcast %cst_17 : f32 to vector<16x32xf32>
    %45 = arith.cmpf ogt, %29, %44 : vector<16x32xf32>
    %cst_18 = arith.constant 9.99999993E-9 : f32
    %46 = vector.broadcast %cst_18 : f32 to vector<16x32xf32>
    %47 = arith.addf %43, %46 : vector<16x32xf32>
    %cst_19 = arith.constant 0.000000e+00 : f32
    %48 = vector.broadcast %cst_19 : f32 to vector<16x32xf32>
    %49 = arith.select %45, %47, %48 : vector<16x32xi1>, vector<16x32xf32>
    %cst_20 = arith.constant dense<0.000000e+00> : vector<16xf32>
    %50 = vector.multi_reduction <add>, %49, %cst_20 [1] : vector<16x32xf32> to vector<16xf32>
    %51 = vector.shape_cast %50 : vector<16xf32> to vector<16x1xf32>
    %52 = vector.broadcast %51 : vector<16x1xf32> to vector<16x32xf32>
    %53 = arith.divf %49, %52 : vector<16x32xf32>
    %cst_21 = arith.constant dense<0.000000e+00> : vector<16x32xf32>
    %54 = tpu.matmul %53, %27, %cst_21 {dimension_numbers = #tpu.dot_dimension_numbers<[1], [0], [0], [1], [0, 0, 1, 1], [], []>} : vector<16x32xf32>, vector<32x32xf32>, vector<16x32xf32> -> vector<16x32xf32>
    %c64 = arith.constant 64 : index
    %c0_22 = arith.constant 0 : index
    %55 = vector.load %arg2[%c64, %c0_22] : memref<72x96xf32, #tpu.memory_space<vmem>>, vector<1x96xf32>
    %c65 = arith.constant 65 : index
    %c0_23 = arith.constant 0 : index
    %56 = vector.load %arg2[%c65, %c0_23] : memref<72x96xf32, #tpu.memory_space<vmem>>, vector<1x96xf32>
    %c32_24 = arith.constant 32 : index
    %c0_25 = arith.constant 0 : index
    %57 = vector.load %arg1[%c32_24, %c0_25] : memref<352x96xf32, #tpu.memory_space<vmem>>, vector<32x96xf32>
    %cst_26 = arith.constant dense<0.000000e+00> : vector<16x96xf32>
    %58 = tpu.matmul %54, %57, %cst_26 {dimension_numbers = #tpu.dot_dimension_numbers<[1], [0], [0], [1], [0, 0, 1, 1], [], []>} : vector<16x32xf32>, vector<32x96xf32>, vector<16x96xf32> -> vector<16x96xf32>
    %59 = vector.broadcast %55 : vector<1x96xf32> to vector<16x96xf32>
    %60 = arith.addf %58, %59 : vector<16x96xf32>
    %c64_27 = arith.constant 64 : index
    %c0_28 = arith.constant 0 : index
    %61 = vector.load %arg1[%c64_27, %c0_28] : memref<352x96xf32, #tpu.memory_space<vmem>>, vector<32x96xf32>
    %cst_29 = arith.constant dense<0.000000e+00> : vector<16x96xf32>
    %62 = tpu.matmul %1, %61, %cst_29 {dimension_numbers = #tpu.dot_dimension_numbers<[1], [0], [0], [1], [0, 0, 1, 1], [], []>} : vector<16x32xf32>, vector<32x96xf32>, vector<16x96xf32> -> vector<16x96xf32>
    %63 = vector.broadcast %56 : vector<1x96xf32> to vector<16x96xf32>
    %64 = arith.addf %62, %63 : vector<16x96xf32>
    %65 = vector.extract_strided_slice %60 {offsets = [0, 0], sizes = [16, 32], strides = [1, 1]} : vector<16x96xf32> to vector<16x32xf32>
    %66 = vector.extract_strided_slice %64 {offsets = [0, 0], sizes = [16, 32], strides = [1, 1]} : vector<16x96xf32> to vector<16x32xf32>
    %67 = arith.addf %65, %66 : vector<16x32xf32>
    %68 = arith.negf %67 : vector<16x32xf32>
    %69 = math.exp %68 : vector<16x32xf32>
    %cst_30 = arith.constant 1.000000e+00 : f32
    %70 = vector.broadcast %cst_30 : f32 to vector<16x32xf32>
    %71 = arith.addf %70, %69 : vector<16x32xf32>
    %72 = arith.divf %70, %71 : vector<16x32xf32>
    %73 = vector.extract_strided_slice %60 {offsets = [0, 32], sizes = [16, 32], strides = [1, 1]} : vector<16x96xf32> to vector<16x32xf32>
    %74 = vector.extract_strided_slice %64 {offsets = [0, 32], sizes = [16, 32], strides = [1, 1]} : vector<16x96xf32> to vector<16x32xf32>
    %75 = arith.addf %73, %74 : vector<16x32xf32>
    %76 = arith.negf %75 : vector<16x32xf32>
    %77 = math.exp %76 : vector<16x32xf32>
    %cst_31 = arith.constant 1.000000e+00 : f32
    %78 = vector.broadcast %cst_31 : f32 to vector<16x32xf32>
    %79 = arith.addf %78, %77 : vector<16x32xf32>
    %80 = arith.divf %78, %79 : vector<16x32xf32>
    %81 = vector.extract_strided_slice %60 {offsets = [0, 64], sizes = [16, 32], strides = [1, 1]} : vector<16x96xf32> to vector<16x32xf32>
    %82 = vector.extract_strided_slice %64 {offsets = [0, 64], sizes = [16, 32], strides = [1, 1]} : vector<16x96xf32> to vector<16x32xf32>
    %83 = arith.mulf %72, %82 : vector<16x32xf32>
    %84 = arith.addf %81, %83 : vector<16x32xf32>
    %85 = math.tanh %84 : vector<16x32xf32>
    %cst_32 = arith.constant 1.000000e+00 : f32
    %86 = vector.broadcast %cst_32 : f32 to vector<16x32xf32>
    %87 = arith.subf %86, %80 : vector<16x32xf32>
    %88 = arith.mulf %87, %85 : vector<16x32xf32>
    %89 = arith.mulf %80, %1 : vector<16x32xf32>
    %90 = arith.addf %88, %89 : vector<16x32xf32>
    %c66 = arith.constant 66 : index
    %c0_33 = arith.constant 0 : index
    %91 = vector.load %arg2[%c66, %c0_33] : memref<72x96xf32, #tpu.memory_space<vmem>>, vector<1x32xf32>
    %c66_34 = arith.constant 66 : index
    %c32_35 = arith.constant 32 : index
    %92 = vector.load %arg2[%c66_34, %c32_35] : memref<72x96xf32, #tpu.memory_space<vmem>>, vector<1x32xf32>
    %cst_36 = arith.constant dense<0.000000e+00> : vector<16xf32>
    %93 = vector.multi_reduction <add>, %90, %cst_36 [1] : vector<16x32xf32> to vector<16xf32>
    %94 = vector.shape_cast %93 : vector<16xf32> to vector<16x1xf32>
    %cst_37 = arith.constant 3.200000e+01 : f32
    %95 = vector.broadcast %cst_37 : f32 to vector<16x1xf32>
    %96 = arith.divf %94, %95 : vector<16x1xf32>
    %97 = vector.broadcast %96 : vector<16x1xf32> to vector<16x32xf32>
    %98 = arith.subf %90, %97 : vector<16x32xf32>
    %99 = arith.mulf %98, %98 : vector<16x32xf32>
    %cst_38 = arith.constant dense<0.000000e+00> : vector<16xf32>
    %100 = vector.multi_reduction <add>, %99, %cst_38 [1] : vector<16x32xf32> to vector<16xf32>
    %101 = vector.shape_cast %100 : vector<16xf32> to vector<16x1xf32>
    %cst_39 = arith.constant 3.200000e+01 : f32
    %102 = vector.broadcast %cst_39 : f32 to vector<16x1xf32>
    %103 = arith.divf %101, %102 : vector<16x1xf32>
    %104 = vector.broadcast %96 : vector<16x1xf32> to vector<16x32xf32>
    %105 = arith.subf %90, %104 : vector<16x32xf32>
    %cst_40 = arith.constant 9.99999974E-6 : f32
    %106 = vector.broadcast %cst_40 : f32 to vector<16x1xf32>
    %107 = arith.addf %103, %106 : vector<16x1xf32>
    %108 = math.rsqrt %107 : vector<16x1xf32>
    %109 = vector.broadcast %108 : vector<16x1xf32> to vector<16x32xf32>
    %110 = arith.mulf %105, %109 : vector<16x32xf32>
    %111 = vector.broadcast %91 : vector<1x32xf32> to vector<16x32xf32>
    %112 = arith.mulf %110, %111 : vector<16x32xf32>
    %113 = vector.broadcast %92 : vector<1x32xf32> to vector<16x32xf32>
    %114 = arith.addf %112, %113 : vector<16x32xf32>
    %c96 = arith.constant 96 : index
    %c0_41 = arith.constant 0 : index
    %115 = vector.load %arg1[%c96, %c0_41] : memref<352x96xf32, #tpu.memory_space<vmem>>, vector<32x64xf32>
    %cst_42 = arith.constant dense<0.000000e+00> : vector<16x64xf32>
    %116 = tpu.matmul %114, %115, %cst_42 {dimension_numbers = #tpu.dot_dimension_numbers<[1], [0], [0], [1], [0, 0, 1, 1], [], []>} : vector<16x32xf32>, vector<32x64xf32>, vector<16x64xf32> -> vector<16x64xf32>
    %c67 = arith.constant 67 : index
    %c0_43 = arith.constant 0 : index
    %117 = vector.load %arg2[%c67, %c0_43] : memref<72x96xf32, #tpu.memory_space<vmem>>, vector<1x64xf32>
    %118 = vector.broadcast %117 : vector<1x64xf32> to vector<16x64xf32>
    %119 = arith.addf %116, %118 : vector<16x64xf32>
    %cst_44 = arith.constant 0.000000e+00 : f32
    %120 = vector.broadcast %cst_44 : f32 to vector<16x64xf32>
    %121 = arith.maximumf %119, %120 : vector<16x64xf32>
    %c128 = arith.constant 128 : index
    %c0_45 = arith.constant 0 : index
    %122 = vector.load %arg1[%c128, %c0_45] : memref<352x96xf32, #tpu.memory_space<vmem>>, vector<64x32xf32>
    %cst_46 = arith.constant dense<0.000000e+00> : vector<16x32xf32>
    %123 = tpu.matmul %121, %122, %cst_46 {dimension_numbers = #tpu.dot_dimension_numbers<[1], [0], [0], [1], [0, 0, 1, 1], [], []>} : vector<16x64xf32>, vector<64x32xf32>, vector<16x32xf32> -> vector<16x32xf32>
    %124 = arith.addf %90, %123 : vector<16x32xf32>
    %c66_47 = arith.constant 66 : index
    %c64_48 = arith.constant 64 : index
    %125 = vector.load %arg2[%c66_47, %c64_48] : memref<72x96xf32, #tpu.memory_space<vmem>>, vector<1x32xf32>
    %126 = vector.broadcast %125 : vector<1x32xf32> to vector<16x32xf32>
    %127 = arith.addf %124, %126 : vector<16x32xf32>
    %c0_49 = arith.constant 0 : index
    %c0_50 = arith.constant 0 : index
    %128 = vector.load %arg3[%c0_49, %c0_50] : memref<32x32xf32, #tpu.memory_space<vmem>>, vector<16x32xf32>
    tpu.vector_store %arg3[%c0_49, %c0_50], %127 {strides = array<i32>} : memref<32x32xf32, #tpu.memory_space<vmem>>, vector<16x32xf32>,
    %c68 = arith.constant 68 : index
    %c0_51 = arith.constant 0 : index
    %129 = vector.load %arg2[%c68, %c0_51] : memref<72x96xf32, #tpu.memory_space<vmem>>, vector<1x32xf32>
    %c68_52 = arith.constant 68 : index
    %c32_53 = arith.constant 32 : index
    %130 = vector.load %arg2[%c68_52, %c32_53] : memref<72x96xf32, #tpu.memory_space<vmem>>, vector<1x32xf32>
    %cst_54 = arith.constant dense<0.000000e+00> : vector<16xf32>
    %131 = vector.multi_reduction <add>, %127, %cst_54 [1] : vector<16x32xf32> to vector<16xf32>
    %132 = vector.shape_cast %131 : vector<16xf32> to vector<16x1xf32>
    %cst_55 = arith.constant 3.200000e+01 : f32
    %133 = vector.broadcast %cst_55 : f32 to vector<16x1xf32>
    %134 = arith.divf %132, %133 : vector<16x1xf32>
    %135 = vector.broadcast %134 : vector<16x1xf32> to vector<16x32xf32>
    %136 = arith.subf %127, %135 : vector<16x32xf32>
    %137 = arith.mulf %136, %136 : vector<16x32xf32>
    %cst_56 = arith.constant dense<0.000000e+00> : vector<16xf32>
    %138 = vector.multi_reduction <add>, %137, %cst_56 [1] : vector<16x32xf32> to vector<16xf32>
    %139 = vector.shape_cast %138 : vector<16xf32> to vector<16x1xf32>
    %cst_57 = arith.constant 3.200000e+01 : f32
    %140 = vector.broadcast %cst_57 : f32 to vector<16x1xf32>
    %141 = arith.divf %139, %140 : vector<16x1xf32>
    %142 = vector.broadcast %134 : vector<16x1xf32> to vector<16x32xf32>
    %143 = arith.subf %127, %142 : vector<16x32xf32>
    %cst_58 = arith.constant 9.99999974E-6 : f32
    %144 = vector.broadcast %cst_58 : f32 to vector<16x1xf32>
    %145 = arith.addf %141, %144 : vector<16x1xf32>
    %146 = math.rsqrt %145 : vector<16x1xf32>
    %147 = vector.broadcast %146 : vector<16x1xf32> to vector<16x32xf32>
    %148 = arith.mulf %143, %147 : vector<16x32xf32>
    %149 = vector.broadcast %129 : vector<1x32xf32> to vector<16x32xf32>
    %150 = arith.mulf %148, %149 : vector<16x32xf32>
    %151 = vector.broadcast %130 : vector<1x32xf32> to vector<16x32xf32>
    %152 = arith.addf %150, %151 : vector<16x32xf32>
    %c192 = arith.constant 192 : index
    %c0_59 = arith.constant 0 : index
    %153 = vector.load %arg1[%c192, %c0_59] : memref<352x96xf32, #tpu.memory_space<vmem>>, vector<32x96xf32>
    %cst_60 = arith.constant dense<0.000000e+00> : vector<16x96xf32>
    %154 = tpu.matmul %152, %153, %cst_60 {dimension_numbers = #tpu.dot_dimension_numbers<[1], [0], [0], [1], [0, 0, 1, 1], [], []>} : vector<16x32xf32>, vector<32x96xf32>, vector<16x96xf32> -> vector<16x96xf32>
    %155 = vector.extract_strided_slice %154 {offsets = [0, 0], sizes = [16, 32], strides = [1, 1]} : vector<16x96xf32> to vector<16x32xf32>
    %156 = vector.extract_strided_slice %154 {offsets = [0, 32], sizes = [16, 32], strides = [1, 1]} : vector<16x96xf32> to vector<16x32xf32>
    %157 = vector.extract_strided_slice %154 {offsets = [0, 64], sizes = [16, 32], strides = [1, 1]} : vector<16x96xf32> to vector<16x32xf32>
    %c48_61 = arith.constant 48 : index
    %c32_62 = arith.constant 32 : index
    %158 = vector.load %arg2[%c48_61, %c32_62] : memref<72x96xf32, #tpu.memory_space<vmem>>, vector<16x16xf32>
    %cst_63 = arith.constant dense<0.000000e+00> : vector<16x16xf32>
    %159 = tpu.matmul %155, %156, %cst_63 {dimension_numbers = #tpu.dot_dimension_numbers<[1], [1], [0], [0], [0, 0, 1, 0], [], []>} : vector<16x32xf32>, vector<16x32xf32>, vector<16x16xf32> -> vector<16x16xf32>
    %cst_64 = arith.constant 0.000000e+00 : f32
    %160 = vector.broadcast %cst_64 : f32 to vector<16x16xf32>
    %161 = arith.cmpf ogt, %158, %160 : vector<16x16xf32>
    %cst_65 = arith.constant -1.000000e+09 : f32
    %162 = vector.broadcast %cst_65 : f32 to vector<16x16xf32>
    %163 = arith.select %161, %159, %162 : vector<16x16xi1>, vector<16x16xf32>
    %cst_66 = arith.constant dense<0xFF800000> : vector<16xf32>
    %164 = vector.multi_reduction <maximumf>, %163, %cst_66 [1] : vector<16x16xf32> to vector<16xf32>
    %165 = vector.shape_cast %164 : vector<16xf32> to vector<16x1xf32>
    %166 = vector.broadcast %165 : vector<16x1xf32> to vector<16x16xf32>
    %167 = arith.subf %163, %166 : vector<16x16xf32>
    %168 = math.exp %167 : vector<16x16xf32>
    %cst_67 = arith.constant dense<0.000000e+00> : vector<16xf32>
    %169 = vector.multi_reduction <add>, %168, %cst_67 [1] : vector<16x16xf32> to vector<16xf32>
    %170 = vector.shape_cast %169 : vector<16xf32> to vector<16x1xf32>
    %171 = vector.broadcast %170 : vector<16x1xf32> to vector<16x16xf32>
    %172 = arith.divf %168, %171 : vector<16x16xf32>
    %cst_68 = arith.constant dense<0.000000e+00> : vector<16x32xf32>
    %173 = tpu.matmul %172, %157, %cst_68 {dimension_numbers = #tpu.dot_dimension_numbers<[1], [0], [0], [1], [0, 0, 1, 1], [], []>} : vector<16x16xf32>, vector<16x32xf32>, vector<16x32xf32> -> vector<16x32xf32>
    %c224 = arith.constant 224 : index
    %c0_69 = arith.constant 0 : index
    %174 = vector.load %arg1[%c224, %c0_69] : memref<352x96xf32, #tpu.memory_space<vmem>>, vector<32x32xf32>
    %cst_70 = arith.constant dense<0.000000e+00> : vector<16x32xf32>
    %175 = tpu.matmul %173, %174, %cst_70 {dimension_numbers = #tpu.dot_dimension_numbers<[1], [0], [0], [1], [0, 0, 1, 1], [], []>} : vector<16x32xf32>, vector<32x32xf32>, vector<16x32xf32> -> vector<16x32xf32>
    %176 = arith.addf %127, %175 : vector<16x32xf32>
    %c69 = arith.constant 69 : index
    %c0_71 = arith.constant 0 : index
    %177 = vector.load %arg2[%c69, %c0_71] : memref<72x96xf32, #tpu.memory_space<vmem>>, vector<1x32xf32>
    %c69_72 = arith.constant 69 : index
    %c32_73 = arith.constant 32 : index
    %178 = vector.load %arg2[%c69_72, %c32_73] : memref<72x96xf32, #tpu.memory_space<vmem>>, vector<1x32xf32>
    %cst_74 = arith.constant dense<0.000000e+00> : vector<16xf32>
    %179 = vector.multi_reduction <add>, %176, %cst_74 [1] : vector<16x32xf32> to vector<16xf32>
    %180 = vector.shape_cast %179 : vector<16xf32> to vector<16x1xf32>
    %cst_75 = arith.constant 3.200000e+01 : f32
    %181 = vector.broadcast %cst_75 : f32 to vector<16x1xf32>
    %182 = arith.divf %180, %181 : vector<16x1xf32>
    %183 = vector.broadcast %182 : vector<16x1xf32> to vector<16x32xf32>
    %184 = arith.subf %176, %183 : vector<16x32xf32>
    %185 = arith.mulf %184, %184 : vector<16x32xf32>
    %cst_76 = arith.constant dense<0.000000e+00> : vector<16xf32>
    %186 = vector.multi_reduction <add>, %185, %cst_76 [1] : vector<16x32xf32> to vector<16xf32>
    %187 = vector.shape_cast %186 : vector<16xf32> to vector<16x1xf32>
    %cst_77 = arith.constant 3.200000e+01 : f32
    %188 = vector.broadcast %cst_77 : f32 to vector<16x1xf32>
    %189 = arith.divf %187, %188 : vector<16x1xf32>
    %190 = vector.broadcast %182 : vector<16x1xf32> to vector<16x32xf32>
    %191 = arith.subf %176, %190 : vector<16x32xf32>
    %cst_78 = arith.constant 9.99999974E-6 : f32
    %192 = vector.broadcast %cst_78 : f32 to vector<16x1xf32>
    %193 = arith.addf %189, %192 : vector<16x1xf32>
    %194 = math.rsqrt %193 : vector<16x1xf32>
    %195 = vector.broadcast %194 : vector<16x1xf32> to vector<16x32xf32>
    %196 = arith.mulf %191, %195 : vector<16x32xf32>
    %197 = vector.broadcast %177 : vector<1x32xf32> to vector<16x32xf32>
    %198 = arith.mulf %196, %197 : vector<16x32xf32>
    %199 = vector.broadcast %178 : vector<1x32xf32> to vector<16x32xf32>
    %200 = arith.addf %198, %199 : vector<16x32xf32>
    %c256 = arith.constant 256 : index
    %c0_79 = arith.constant 0 : index
    %201 = vector.load %arg1[%c256, %c0_79] : memref<352x96xf32, #tpu.memory_space<vmem>>, vector<32x64xf32>
    %cst_80 = arith.constant dense<0.000000e+00> : vector<16x64xf32>
    %202 = tpu.matmul %200, %201, %cst_80 {dimension_numbers = #tpu.dot_dimension_numbers<[1], [0], [0], [1], [0, 0, 1, 1], [], []>} : vector<16x32xf32>, vector<32x64xf32>, vector<16x64xf32> -> vector<16x64xf32>
    %c70 = arith.constant 70 : index
    %c0_81 = arith.constant 0 : index
    %203 = vector.load %arg2[%c70, %c0_81] : memref<72x96xf32, #tpu.memory_space<vmem>>, vector<1x64xf32>
    %204 = vector.broadcast %203 : vector<1x64xf32> to vector<16x64xf32>
    %205 = arith.addf %202, %204 : vector<16x64xf32>
    %cst_82 = arith.constant 0.000000e+00 : f32
    %206 = vector.broadcast %cst_82 : f32 to vector<16x64xf32>
    %207 = arith.maximumf %205, %206 : vector<16x64xf32>
    %c288 = arith.constant 288 : index
    %c0_83 = arith.constant 0 : index
    %208 = vector.load %arg1[%c288, %c0_83] : memref<352x96xf32, #tpu.memory_space<vmem>>, vector<64x32xf32>
    %cst_84 = arith.constant dense<0.000000e+00> : vector<16x32xf32>
    %209 = tpu.matmul %207, %208, %cst_84 {dimension_numbers = #tpu.dot_dimension_numbers<[1], [0], [0], [1], [0, 0, 1, 1], [], []>} : vector<16x64xf32>, vector<64x32xf32>, vector<16x32xf32> -> vector<16x32xf32>
    %210 = arith.addf %176, %209 : vector<16x32xf32>
    %c67_85 = arith.constant 67 : index
    %c64_86 = arith.constant 64 : index
    %211 = vector.load %arg2[%c67_85, %c64_86] : memref<72x96xf32, #tpu.memory_space<vmem>>, vector<1x32xf32>
    %212 = vector.broadcast %211 : vector<1x32xf32> to vector<16x32xf32>
    %213 = arith.addf %210, %212 : vector<16x32xf32>
    %c16 = arith.constant 16 : index
    %c0_87 = arith.constant 0 : index
    %214 = vector.load %arg3[%c16, %c0_87] : memref<32x32xf32, #tpu.memory_space<vmem>>, vector<16x32xf32>
    tpu.vector_store %arg3[%c16, %c0_87], %213 {strides = array<i32>} : memref<32x32xf32, #tpu.memory_space<vmem>>, vector<16x32xf32>,
    return
  }
}

</mosaic_0001>

<bundles_post_ra>
// kernel: run_fused.1
= control target key start
LH: loop header
LB: loop body
LE: loop exit
PB: predicated region body
PF: predicated region fallthrough
CT: control target
= control target key end

     0   :  { %vm26_vm0 = vcmask 261120   ;;  %s2216_s25 = smov 96   ;;  %s2217_s17 = smov 64   ;;  %vm893_vm4 = vcmask 523264   ;;  %vm1239_vm5 = vcmask 392448   ;;  %vm1260_vm6 = vcmask 130048   ;;  %s2702_s0 = inlined_call_operand.vmem [shape: f32[48,32], index: 0, kind: input, shape index: {}]   ;;  %s2703_s2 = inlined_call_operand.vmem [shape: f32[72,96], index: 2, kind: input, shape index: {}]   ;;  %s2704_s1 = inlined_call_operand.vmem [shape: f32[352,96], index: 1, kind: input, shape index: {}]   ;;  %s2705_s3 = inlined_call_operand.vmem [shape: f32[32,32], index: 3, kind: output, shape index: {}]  }
   0x1   :  { %v14_v0 = vld [vmem:[%s2702_s0] sm:$0xff]  ;;  %v16_v1 = vld [vmem:[%s2702_s0 + $0x10] sm:$0xff]  ;;  %v15_v2 = vld [vmem:[%s2702_s0 + $0x8] sm:$0xff]  ;;  %s2218_s15 = smov 32  }
   0x2   :  { %v27_v3 = vsel %vm26_vm0, %v14_v0, 0.0  ;;  %v33_v4 = vsel %vm26_vm0, %v16_v1, 0.0  ;;  %v17_v5 = vld [vmem:[%s2702_s0 + $0x18] sm:$0xff]  ;;  %v30_v6 = vsel %vm26_vm0, %v15_v2, 0.0  ;;  %v2258_v8 = vld [vmem:[%s2702_s0 + $0x20] sm:$0xff]  ;;  %v2263_v9 = vld [vmem:[%s2702_s0 + $0x28] sm:$0xff] }
   0x3   :  { %28 = vadd.xlane.f32.xlu0 %v27_v3  ;;  %34 = vadd.xlane.f32.xlu1 %v33_v4  ;;  %v36_v7 = vsel %vm26_vm0, %v17_v5, 0.0  ;;  %v39_v10 = vsel %vm26_vm0, %v2258_v8, 0.0  ;;  %v42_v11 = vsel %vm26_vm0, %v2263_v9, 0.0  ;;  %v21_v37 = vld [vmem:[%s2703_s2 + $0x8] sm:$0xff]  ;;  %v22_v38 = vld [vmem:[%s2703_s2 + $0x10] sm:$0xff]  ;;  %v20_v39 = vld [vmem:[%s2703_s2] sm:$0xff] }
   0x4   :  { %v142_v40 = vld [vmem:[%s2704_s1] sm:$0xff]  ;;  %v143_v41 = vld [vmem:[%s2704_s1 + $0x8] sm:$0xff]  ;;  %v23_v42 = vld [vmem:[%s2703_s2 + $0x18] sm:$0xff] }
   0x5   :  { %v2021_v43 = vpack.c.bf16 %v143_v41, %v142_v40  ;;  %v2319_v44 = vld [vmem:[%s2703_s2 + $0x20] sm:$0xff]  ;;  %v144_v45 = vld [vmem:[%s2704_s1 + $0x10] sm:$0xff]  ;;  %v145_v46 = vld [vmem:[%s2704_s1 + $0x18] sm:$0xff] }
   0x6   :  { %v2025_v47 = vpack.c.bf16 %v145_v46, %v144_v45  ;;  %v25_v53 = vld [vmem:[%s2703_s2 + $0x28] sm:$0xff]  ;;  %vm2354_vm1 = vmpackc.low %vm26_vm0, %vm26_vm0 }
   0x7   :  { %31 = vadd.xlane.f32.xlu0 %v30_v6  ;;  %37 = vadd.xlane.f32.xlu1 %v36_v7 }
   0x8   :  { %2022 = vmatprep.subr.bf16.mxu1 %v2021_v43 }
   0x9   :  { %2024 = vmatpush3.bf16.msra.mxu1 %v2021_v43 }
   0xa   :  { %2026 = vmatprep.subr.bf16.mxu1 %v2025_v47 }
   0xb   :  { %40 = vadd.xlane.f32.xlu0 %v39_v10  ;;  %43 = vadd.xlane.f32.xlu1 %v42_v11 }
   0xd   :  { %2028 = vmatpush3.bf16.msra.mxu1 %v2025_v47 }
  0x90   :  { %v29_v12 = vpop.xlane.xlu0 %28  ;;  %v35_v13 = vpop.xlane.xlu1 %34 }
  0x91   :  { %v46_v14 = vmul.f32 0.03125, %v29_v12  ;;  %v48_v15 = vmul.f32 0.03125, %v35_v13 }
  0x93   :  { %v2269_v16 = vsub.f32 %v14_v0, %v46_v14  ;;  %v2271_v17 = vsub.f32 %v16_v1, %v48_v15 }
  0x94   :  { %v32_v18 = vpop.xlane.xlu0 %31  ;;  %v38_v19 = vpop.xlane.xlu1 %37 }
  0x95   :  { %v47_v20 = vmul.f32 0.03125, %v32_v18  ;;  %v49_v21 = vmul.f32 0.03125, %v38_v19  ;;  %v58_v22 = vmul.f32 %v2269_v16, %v2269_v16  ;;  %v60_v23 = vmul.f32 %v2271_v17, %v2271_v17 }
  0x97   :  { %v2277_v24 = vsub.f32 %v15_v2, %v47_v20  ;;  %v2279_v25 = vsub.f32 %v17_v5, %v49_v21  ;;  %v64_v26 = vsel %vm26_vm0, %v58_v22, 0.0  ;;  %v70_v29 = vsel %vm26_vm0, %v60_v23, 0.0 }
  0x98   :  { %65 = vadd.xlane.f32.xlu0 %v64_v26  ;;  %v41_v27 = vpop.xlane.xlu0 %40  ;;  %v44_v48 = vpop.xlane.xlu1 %43 }
  0x99   :  { %v50_v28 = vmul.f32 0.03125, %v41_v27  ;;  %v59_v30 = vmul.f32 %v2277_v24, %v2277_v24  ;;  %v61_v31 = vmul.f32 %v2279_v25, %v2279_v25  ;;  %v51_v49 = vmul.f32 0.03125, %v44_v48 }
  0x9b   :  { %v2288_v32 = vsub.f32 %v2258_v8, %v50_v28  ;;  %v67_v33 = vsel %vm26_vm0, %v59_v30, 0.0  ;;  %v73_v34 = vsel %vm26_vm0, %v61_v31, 0.0  ;;  %v57_v50 = vsub.f32 %v2263_v9, %v51_v49 }
  0x9c   :  { %71 = vadd.xlane.f32.xlu0 %v70_v29  ;;  %68 = vadd.xlane.f32.xlu1 %v67_v33 }
  0x9d   :  { %v62_v35 = vmul.f32 %v2288_v32, %v2288_v32  ;;  %v63_v51 = vmul.f32 %v57_v50, %v57_v50 }
  0x9f   :  { %v76_v36 = vsel %vm26_vm0, %v62_v35, 0.0  ;;  %v79_v52 = vsel %vm26_vm0, %v63_v51, 0.0 }
  0xa0   :  { %74 = vadd.xlane.f32.xlu1 %v73_v34  ;;  %77 = vadd.xlane.f32.xlu0 %v76_v36 }
  0xb1   :  { %120 = vrot.lane.b32.xlu1 %v21_v37, %s2216_s25 }
  0xb5   :  { %122 = vrot.lane.b32.xlu1 %v22_v38, %s2216_s25 }
  0xb6   :  { %118 = vrot.lane.b32.xlu0 %v20_v39, %s2216_s25 }
  0xb9   :  { %124 = vrot.lane.b32.xlu1 %v23_v42, %s2216_s25 }
  0xba   :  { %126 = vrot.lane.b32.xlu0 %v2319_v44, %s2216_s25 }
  0xdd   :  { %80 = vadd.xlane.f32.xlu1 %v79_v52 }
  0xee   :  { %128 = vrot.lane.b32.xlu1 %v25_v53, %s2216_s25 }
 0x125   :  { %v66_v54 = vpop.xlane.xlu0 %65 }
 0x126   :  { %v82_v55 = vmul.f32 0.03125, %v66_v54  ;;  %v2386_v54 = vld [vmem:[%s2703_s2 + $0x30] sm:$0xff] }
 0x127   :  { %vm358_vm3 = vcmp.gt.f32.partialorder %v2386_v54, 0.0 }
 0x128   :  { %v88_v56 = vadd.f32 1e-05, %v82_v55 }
 0x129   :  { %v69_v57 = vpop.xlane.xlu1 %68  ;;  %v72_v58 = vpop.xlane.xlu0 %71 }
 0x12a   :  { %2162 = vrsqrt.f32 %v88_v56  ;;  %v83_v59 = vmul.f32 0.03125, %v69_v57  ;;  %v84_v60 = vmul.f32 0.03125, %v72_v58 }
 0x12c   :  { %v89_v61 = vadd.f32 1e-05, %v83_v59  ;;  %v90_v62 = vadd.f32 1e-05, %v84_v60 }
 0x12d   :  { %v75_v63 = vpop.xlane.xlu1 %74  ;;  %v78_v0 = vpop.xlane.xlu0 %77 }
 0x12e   :  { %2164 = vrsqrt.f32 %v89_v61  ;;  %v85_v1 = vmul.f32 0.03125, %v75_v63  ;;  %v86_v2 = vmul.f32 0.03125, %v78_v0 }
 0x12f   :  { %2166 = vrsqrt.f32 %v90_v62 }
 0x130   :  { %v91_v3 = vadd.f32 1e-05, %v85_v1  ;;  %v92_v4 = vadd.f32 1e-05, %v86_v2 }
 0x131   :  { %v121_v6 = vpop.permute.xlu1 %120  ;;  %v119_v10 = vpop.permute.xlu0 %118 }
 0x132   :  { %2168 = vrsqrt.f32 %v91_v3 }
 0x133   :  { %2170 = vrsqrt.f32 %v92_v4 }
 0x134   :  { %v2163_v5 = vpop.eup %2162 }
 0x135   :  { %v100_v7 = vmul.f32 %v2163_v5, %v2269_v16  ;;  %v123_v18 = vpop.permute.xlu1 %122 }
 0x137   :  { %v106_v11 = vmul.f32 %v100_v7, %v20_v39 }
 0x138   :  { %v2165_v12 = vpop.eup %2164 }
 0x139   :  { %v2167_v13 = vpop.eup %2166  ;;  %v101_v14 = vmul.f32 %v2165_v12, %v2277_v24  ;;  %v136_v15 = vadd.f32 %v119_v10, %v106_v11  ;;  %v127_v24 = vpop.permute.xlu0 %126 }
 0x13a   :  { %v102_v19 = vmul.f32 %v2167_v13, %v2271_v17  ;;  %v125_v30 = vpop.permute.xlu1 %124 }
 0x13b   :  { %v107_v20 = vmul.f32 %v101_v14, %v21_v37  ;;  %1872 = vmatprep.mubr.msk.f32.mxu1 %vm26_vm0, %v136_v15 }
 0x13c   :  { %v2169_v21 = vpop.eup %2168  ;;  %v108_v22 = vmul.f32 %v102_v19, %v22_v38 }
 0x13d   :  { %v2171_v23 = vpop.eup %2170  ;;  %v137_v26 = vadd.f32 %v121_v6, %v107_v20  ;;  %v103_v27 = vmul.f32 %v2169_v21, %v2279_v25 }
 0x13e   :  { %v138_v16 = vadd.f32 %v123_v18, %v108_v22  ;;  %v104_v28 = vmul.f32 %v2171_v23, %v2288_v32 }
 0x13f   :  { %v109_v29 = vmul.f32 %v103_v27, %v23_v42  ;;  %1873 = vmatmul.mubr.msk.f32.vlgmr.msra.gmra.mrb[0].mxu1 %vm26_vm0, %v137_v26 }
 0x140   :  { %1875 = vmatprep.mubr.msk.f32.mxu1 %vm26_vm0, %v138_v16  ;;  %v110_v17 = vmul.f32 %v104_v28, %v2319_v44 }
 0x141   :  { %v139_v31 = vadd.f32 %v125_v30, %v109_v29 }
 0x142   :  { %v140_v33 = vadd.f32 %v127_v24, %v110_v17 }
 0x143   :  { %1876 = vmatmul.mubr.msk.f32.gmra.mrb[2].mxu1 %vm26_vm0, %v139_v31  ;;  %v498_v31 = vld [vmem:[%s2704_s1 + $0x20] sm:$0xff] }
 0x144   :  { %1878 = vmatprep.mubr.msk.f32.mxu1 %vm26_vm0, %v140_v33  ;;  %v499_v33 = vld [vmem:[%s2704_s1 + $0x28] sm:$0xff] }
 0x16a   :  { %v81_v34 = vpop.xlane.xlu1 %80 }
 0x16b   :  { %v87_v25 = vmul.f32 0.03125, %v81_v34  ;;  %v500_v34 = vld [vmem:[%s2704_s1 + $0x30] sm:$0xff] }
 0x16d   :  { %v93_v35 = vadd.f32 1e-05, %v87_v25  ;;  %v2049_v25 = vpack.c.bf16 %v499_v33, %v498_v31 }
 0x16e   :  { %v129_v37 = vpop.permute.xlu1 %128 }
 0x16f   :  { %2172 = vrsqrt.f32 %v93_v35  ;;  %v501_v35 = vld [vmem:[%s2704_s1 + $0x38] sm:$0xff] }
 0x179   :  { %v2173_v32 = vpop.eup %2172 }
 0x17a   :  { %v105_v36 = vmul.f32 %v2173_v32, %v57_v50  ;;  %v2053_v32 = vpack.c.bf16 %v501_v35, %v500_v34 }
 0x17c   :  { %v111_v38 = vmul.f32 %v105_v36, %v25_v53  ;;  %v2381_v53 = vld [vmem:[%s2703_s2 + $0x38] sm:$0xff] }
 0x17d   :  { %vm359_vm2 = vcmp.gt.f32.partialorder %v2381_v53, 0.0 }
 0x17e   :  { %v141_v39 = vadd.f32 %v129_v37, %v111_v38 }
 0x180   :  { %1879 = vmatmul.mubr.msk.f32.gmra.mrb[4].mxu1 %vm26_vm0, %v141_v39 }
 0x212   :  { %v2348_v40 = vpop.f32.mrb[0].mxu1 }
 0x213   :  { %v2350_v41 = vpop.f32.mrb[1].mxu1 }
 0x214   :  { %v2142_v43 = vpack.i.bf16 %v2348_v40, %v2350_v41  ;;  %v2029_v44 = vpack.c.bf16 %v2348_v40, %v2350_v41 }
 0x216   :  { %v2362_v45 = vpop.f32.mrb[2].mxu1  ;;  %2031 = vmatprep.subr.msk.bf16.mxu1 %vm2354_vm1, %v2029_v44 }
 0x217   :  { %v240_v46 = vpop.f32.mrb[3].mxu1  ;;  %2034 = vmatpush3.bf16.xpose.msk.msra.mxu1 %vm2354_vm1, %v2029_v44 }
 0x218   :  { %v2147_v47 = vpack.i.bf16 %v2362_v45, %v240_v46  ;;  %v2035_v48 = vpack.c.bf16 %v2362_v45, %v240_v46  ;;  %v587_v46 = vld [vmem:[%s2704_s1 + $0x40] sm:$0xff] }
 0x21a   :  { %2037 = vmatprep.subr.msk.bf16.mxu1 %vm2354_vm1, %v2035_v48 }
 0x21f   :  { %2040 = vmatpush3.bf16.xpose.msk.msra.mxu1 %vm2354_vm1, %v2035_v48 }
 0x220   :  { %2050 = vmatprep.subr.bf16.mxu1 %v2049_v25 }
 0x253   :  { %v1880_v49 = vpop.f32.mrb[4].mxu1 }
 0x254   :  { %265 = vrot.lane.b32.xlu1 %v1880_v49, %s2217_s17  ;;  %v250_v50 = vpop.f32.mrb[5].mxu1 }
 0x255   :  { %263 = vrot.lane.b32.xlu0 %v250_v50, %s2217_s17 }
 0x2c6   :  { %v266_v52 = vpop.permute.xlu1 %265 }
 0x2c7   :  { %v264_v51 = vpop.permute.xlu0 %263 }
 0x2c8   :  { %1889 = vmatprep.mubr.msk.f32.mxu1 %vm26_vm0, %v264_v51 }
 0x2c9   :  { %1890 = vmatmul.mubr.msk.f32.vlgmr.msra.gmra.mrb[6].mxu1 %vm26_vm0, %v266_v52  ;;  %v589_v52 = vld [vmem:[%s2704_s1 + $0x50] sm:$0xff] }
 0x2ca   :  { %2052 = vmatpush3.bf16.msra.mxu1 %v2049_v25 }
 0x2cb   :  { %2054 = vmatprep.subr.bf16.mxu1 %v2053_v32 }
 0x2ce   :  { %2056 = vmatpush3.bf16.msra.mxu1 %v2053_v32 }
 0x39c   :  { %v1891_v55 = vpop.f32.mrb[6].mxu1 }
 0x39d   :  { %v361_v56 = vsel %vm359_vm2, %v1891_v55, -1e+09  ;;  %v349_v57 = vpop.f32.mrb[7].mxu1  ;;  %v590_v55 = vld [vmem:[%s2704_s1 + $0x58] sm:$0xff] }
 0x39e   :  { %v363_v58 = vsel %vm26_vm0, %v361_v56, -inf  ;;  %v360_v59 = vsel %vm358_vm3, %v349_v57, -1e+09 }
 0x39f   :  { %v362_v60 = vsel %vm26_vm0, %v360_v59, -inf }
 0x3a0   :  { %v364_v61 = vmax.f32 %v362_v60, %v363_v58  ;;  %v2061_v58 = vpack.c.bf16 %v590_v55, %v589_v52 }
 0x3a2   :  { %v365_v62 = vrot.slane %v364_v61, 4 }
 0x3a4   :  { %v366_v63 = vmax.f32 %v364_v61, %v365_v62  ;;  %v1749_v61 = vld [vmem:[%s2703_s2 + $0x41] ss:$0 sm:$0xff] }
 0x3a6   :  { %v367_v0 = vrot.slane %v366_v63, 2 }
 0x3a8   :  { %v368_v1 = vmax.f32 %v366_v63, %v367_v0 }
 0x3aa   :  { %v369_v2 = vrot.slane %v368_v1, 1 }
 0x3ac   :  { %v370_v3 = vmax.f32 %v368_v1, %v369_v2  ;;  %v1746_v2 = vld [vmem:[%s2703_s2 + $0x40] ss:$0 sm:$0xff] }
 0x3ae   :  { %v371_v4 = vsub.f32 %v360_v59, %v370_v3  ;;  %v372_v5 = vsub.f32 %v361_v56, %v370_v3 }
 0x3b0   :  { %v373_v6 = vmul.f32 1.442695, %v371_v4  ;;  %v375_v7 = vmul.f32 1.442695, %v372_v5 }
 0x3b2   :  { %2174 = vpow2.f32 %v373_v6 }
 0x3b3   :  { %2176 = vpow2.f32 %v375_v7 }
 0x3bc   :  { %v2175_v10 = vpop.eup %2174 }
 0x3bd   :  { %v2177_v11 = vpop.eup %2176  ;;  %v377_v12 = vsel %vm26_vm0, %v2175_v10, 0.0 }
 0x3be   :  { %v378_v13 = vsel %vm26_vm0, %v2177_v11, 0.0 }
 0x3bf   :  { %v379_v14 = vadd.f32 %v378_v13, %v377_v12 }
 0x3c1   :  { %v380_v15 = vrot.slane %v379_v14, 4 }
 0x3c3   :  { %v381_v18 = vadd.f32 %v380_v15, %v379_v14 }
 0x3c5   :  { %v382_v19 = vrot.slane %v381_v18, 2 }
 0x3c7   :  { %v383_v20 = vadd.f32 %v382_v19, %v381_v18 }
 0x3c9   :  { %v384_v21 = vrot.slane %v383_v20, 1 }
 0x3cb   :  { %v385_v22 = vadd.f32 %v384_v21, %v383_v20 }
 0x3cd   :  { %2178 = vrcp.f32 %v385_v22 }
 0x3d7   :  { %v2179_v23 = vpop.eup %2178 }
 0x3d8   :  { %v388_v26 = vmul.f32 %v2179_v23, %v2177_v11  ;;  %v387_v27 = vmul.f32 %v2179_v23, %v2175_v10 }
 0x3da   :  { %v390_v16 = vadd.f32 1e-08, %v388_v26  ;;  %v389_v28 = vadd.f32 1e-08, %v387_v27 }
 0x3dc   :  { %v392_v29 = vsel %vm359_vm2, %v390_v16, 0.0  ;;  %v391_v24 = vsel %vm358_vm3, %v389_v28, 0.0 }
 0x3dd   :  { %v396_v30 = vsel %vm26_vm0, %v392_v29, 0.0  ;;  %v393_v17 = vsel %vm26_vm0, %v391_v24, 0.0 }
 0x3de   :  { %397 = vadd.xlane.f32.xlu1 %v396_v30  ;;  %394 = vadd.xlane.f32.xlu0 %v393_v17 }
 0x3ef   :  { %2148 = vrot.lane.b32.xlu1 %v2147_v47, %s2216_s25  ;;  %v588_v47 = vld [vmem:[%s2704_s1 + $0x48] sm:$0xff] }
 0x3f0   :  { %v2057_v50 = vpack.c.bf16 %v588_v47, %v587_v46 }
 0x3f4   :  { %2143 = vrot.lane.b32.xlu0 %v2142_v43, %s2216_s25 }
 0x46b   :  { %v398_v36 = vpop.xlane.xlu1 %397  ;;  %v395_v37 = vpop.xlane.xlu0 %394 }
 0x46c   :  { %2180 = vrcp.f32 %v398_v36 }
 0x46d   :  { %2182 = vrcp.f32 %v395_v37 }
 0x46f   :  { %v2149_v38 = vpop.permute.xlu1 %2148  ;;  %v2144_v39 = vpop.permute.xlu0 %2143 }
 0x470   :  { %v2151_v40 = vunpack.i.h.bf16 %v2149_v38  ;;  %v2150_v41 = vunpack.i.l.bf16 %v2149_v38  ;;  %v2146_v43 = vunpack.i.h.bf16 %v2144_v39  ;;  %v2145_v44 = vunpack.i.l.bf16 %v2144_v39 }
 0x472   :  { %v2041_v45 = vpack.c.bf16 %v2146_v43, %v2145_v44  ;;  %v2045_v48 = vpack.c.bf16 %v2151_v40, %v2150_v41 }
 0x474   :  { %2042 = vmatprep.subr.bf16.mxu0 %v2041_v45 }
 0x475   :  { %2044 = vmatpush3.bf16.msra.mxu0 %v2041_v45 }
 0x476   :  { %v2181_v49 = vpop.eup %2180  ;;  %2046 = vmatprep.subr.bf16.mxu0 %v2045_v48 }
 0x477   :  { %v2183_v51 = vpop.eup %2182  ;;  %v402_v57 = vmul.f32 %v2181_v49, %v392_v29 }
 0x478   :  { %v400_v56 = vmul.f32 %v2183_v51, %v391_v24 }
 0x479   :  { %2048 = vmatpush3.bf16.msra.mxu0 %v2045_v48 }
 0x47a   :  { %1900 = vmatprep.mubr.msk.f32.mxu0 %vm26_vm0, %v400_v56  ;;  %2058 = vmatprep.subr.bf16.mxu0 %v2057_v50 }
 0x47c   :  { %1901 = vmatmul.mubr.msk.f32.vlgmr.msra.gmra.mrb[0].mxu0 %vm26_vm0, %v402_v57 }
 0x47d   :  { %2060 = vmatpush3.bf16.msra.mxu0 %v2057_v50  ;;  %1922 = vmatprep.mubr.msk.f32.mxu0 %vm26_vm0, %v2258_v8 }
 0x47e   :  { %2062 = vmatprep.subr.bf16.mxu0 %v2061_v58 }
 0x481   :  { %2064 = vmatpush3.bf16.msra.mxu0 %v2061_v58  ;;  %v2476_v58 = vld [vmem:[%s2703_s2 + $0x42] ss:$0 sm:$0xff] }
 0x484   :  { %1923 = vmatmul.mubr.msk.f32.vlgmr.msra.gmra.mrb[2].mxu0 %vm26_vm0, %v2263_v9 }
 0x54f   :  { %v1902_v59 = vpop.f32.mrb[0].mxu0 }
 0x550   :  { %v487_v60 = vpop.f32.mrb[1].mxu0 }
 0x551   :  { %1911 = vmatprep.mubr.msk.f32.mxu1 %vm26_vm0, %v487_v60  ;;  %v790_v60 = vld [vmem:[%s2704_s1 + $0x68] sm:$0xff] }
 0x552   :  { %1912 = vmatmul.mubr.msk.f32.vlgmr.msra.gmra.mrb[8].mxu1 %vm26_vm0, %v1902_v59  ;;  %v789_v59 = vld [vmem:[%s2704_s1 + $0x60] sm:$0xff] }
 0x557   :  { %v1924_v62 = vpop.f32.mrb[2].mxu0 }
 0x558   :  { %v673_v63 = vadd.f32 %v1924_v62, %v1749_v61  ;;  %v667_v0 = vpop.f32.mrb[3].mxu0 }
 0x559   :  { %v668_v1 = vadd.f32 %v1749_v61, %v667_v0  ;;  %v2065_v61 = vpack.c.bf16 %v790_v60, %v789_v59 }
 0x55a   :  { %694 = vrot.lane.b32.xlu1 %v673_v63, %s2217_s17 }
 0x55b   :  { %692 = vrot.lane.b32.xlu0 %v668_v1, %s2217_s17  ;;  %2066 = vmatprep.subr.bf16.mxu1 %v2065_v61 }
 0x55c   :  { %2068 = vmatpush3.bf16.msra.mxu1 %v2065_v61 }
 0x5cc   :  { %v695_v19 = vpop.permute.xlu1 %694 }
 0x5cd   :  { %v693_v20 = vpop.permute.xlu0 %692 }
 0x625   :  { %v1913_v3 = vpop.f32.mrb[8].mxu1 }
 0x626   :  { %v584_v4 = vadd.f32 %v1913_v3, %v1746_v2  ;;  %v578_v5 = vpop.f32.mrb[9].mxu1 }
 0x627   :  { %v579_v6 = vadd.f32 %v1746_v2, %v578_v5  ;;  %v792_v5 = vld [vmem:[%s2704_s1 + $0x78] sm:$0xff] }
 0x628   :  { %v677_v7 = vadd.f32 %v673_v63, %v584_v4 }
 0x629   :  { %v676_v10 = vadd.f32 %v668_v1, %v579_v6 }
 0x62a   :  { %v1753_v11 = vmul.f32 -1.442695, %v677_v7  ;;  %v885_v7 = vld [vmem:[%s2704_s1 + $0x80] sm:$0xff] }
 0x62b   :  { %v1752_v12 = vmul.f32 -1.442695, %v676_v10  ;;  %v886_v10 = vld [vmem:[%s2704_s1 + $0x88] sm:$0xff] }
 0x62c   :  { %2184 = vpow2.f32 %v1753_v11  ;;  %v887_v11 = vld [vmem:[%s2704_s1 + $0x90] sm:$0xff] }
 0x62d   :  { %2186 = vpow2.f32 %v1752_v12  ;;  %v2073_v12 = vpack.c.bf16 %v886_v10, %v885_v7 }
 0x62f   :  { %2074 = vmatprep.subr.bf16.mxu0 %v2073_v12 }
 0x630   :  { %2076 = vmatpush3.bf16.msra.mxu0 %v2073_v12 }
 0x636   :  { %v2185_v13 = vpop.eup %2184 }
 0x637   :  { %v2187_v14 = vpop.eup %2186  ;;  %v685_v15 = vadd.f32 1.0, %v2185_v13  ;;  %v888_v13 = vld [vmem:[%s2704_s1 + $0x98] sm:$0xff] }
 0x638   :  { %v684_v18 = vadd.f32 1.0, %v2187_v14 }
 0x639   :  { %2188 = vrcp.f32 %v685_v15 }
 0x63a   :  { %2190 = vrcp.f32 %v684_v18  ;;  %v2077_v18 = vpack.c.bf16 %v888_v13, %v887_v11 }
 0x63c   :  { %2078 = vmatprep.subr.bf16.mxu0 %v2077_v18 }
 0x63d   :  { %2080 = vmatpush3.bf16.msra.mxu0 %v2077_v18 }
 0x643   :  { %v2189_v21 = vpop.eup %2188 }
 0x644   :  { %v2191_v22 = vpop.eup %2190  ;;  %v699_v23 = vmul.f32 %v2189_v21, %v695_v19  ;;  %v889_v19 = vld [vmem:[%s2704_s1 + $0xa0] sm:$0xff] }
 0x645   :  { %v698_v26 = vmul.f32 %v2191_v22, %v693_v20  ;;  %v712_v31 = vsub.f32 1.0, %v2191_v22  ;;  %v890_v20 = vld [vmem:[%s2704_s1 + $0xa8] sm:$0xff] }
 0x646   :  { %704 = vrot.lane.b32.xlu1 %v699_v23, %s2217_s17  ;;  %v2081_v23 = vpack.c.bf16 %v890_v20, %v889_v19 }
 0x647   :  { %702 = vrot.lane.b32.xlu0 %v698_v26, %s2217_s17 }
 0x648   :  { %2082 = vmatprep.subr.bf16.mxu0 %v2081_v23 }
 0x649   :  { %2084 = vmatpush3.bf16.msra.mxu0 %v2081_v23 }
 0x64a   :  { %724 = vrot.lane.b32.xlu1 %v2258_v8, %s2218_s15 }
 0x64e   :  { %726 = vrot.lane.b32.xlu1 %v2263_v9, %s2218_s15  ;;  %v713_v9 = vsub.f32 1.0, %v2189_v21 }
 0x6b8   :  { %v705_v27 = vpop.permute.xlu1 %704 }
 0x6b9   :  { %v703_v16 = vpop.permute.xlu0 %702  ;;  %v709_v29 = vadd.f32 %v705_v27, %v584_v4  ;;  %v791_v4 = vld [vmem:[%s2704_s1 + $0x70] sm:$0xff] }
 0x6ba   :  { %v708_v28 = vadd.f32 %v703_v16, %v579_v6  ;;  %v2069_v6 = vpack.c.bf16 %v792_v5, %v791_v4  ;;  %v1049_v4 = vld [vmem:[%s2704_s1 + $0xd0] sm:$0xff] }
 0x6bc   :  { %2192 = vtanh.f32 %v708_v28  ;;  %v725_v17 = vpop.permute.xlu1 %724  ;;  %2070 = vmatprep.subr.bf16.mxu1 %v2069_v6 }
 0x6bd   :  { %2194 = vtanh.f32 %v709_v29  ;;  %v730_v34 = vmul.f32 %v2191_v22, %v725_v17  ;;  %2072 = vmatpush3.bf16.msra.mxu1 %v2069_v6  ;;  %v891_v17 = vld [vmem:[%s2704_s1 + $0xb0] sm:$0xff]  ;;  %v1050_v6 = vld [vmem:[%s2704_s1 + $0xd8] sm:$0xff] }
 0x6be   :  { %v2093_v7 = vpack.c.bf16 %v1050_v6, %v1049_v4  ;;  %v1364_v4 = vld [vmem:[%s2704_s1 + $0xf0] sm:$0xff] }
 0x6c0   :  { %v727_v25 = vpop.permute.xlu1 %726 }
 0x6c1   :  { %v731_v36 = vmul.f32 %v2189_v21, %v727_v25 }
 0x6c6   :  { %v2193_v24 = vpop.eup %2192 }
 0x6c7   :  { %716 = vrot.lane.b32.xlu0 %v2193_v24, %s2216_s25  ;;  %v2195_v30 = vpop.eup %2194 }
 0x6cb   :  { %718 = vrot.lane.b32.xlu0 %v2195_v30, %s2216_s25 }
 0x739   :  { %v717_v33 = vpop.permute.xlu0 %716 }
 0x73a   :  { %v722_v8 = vmul.f32 %v717_v33, %v712_v31  ;;  %v892_v31 = vld [vmem:[%s2704_s1 + $0xb8] sm:$0xff] }
 0x73b   :  { %v2085_v33 = vpack.c.bf16 %v892_v31, %v891_v17 }
 0x73c   :  { %v2457_v35 = vadd.f32 %v730_v34, %v722_v8  ;;  %v2525_v34 = vld [vmem:[%s2703_s2 + $0x43] ss:$0 sm:$0xff] }
 0x73d   :  { %v719_v32 = vpop.permute.xlu0 %718  ;;  %2086 = vmatprep.subr.bf16.mxu0 %v2085_v33 }
 0x73e   :  { %v723_v37 = vmul.f32 %v719_v32, %v713_v9  ;;  %737 = vrot.lane.b32.xlu0 %v2457_v35, %s2216_s25  ;;  %2088 = vmatpush3.bf16.msra.mxu0 %v2085_v33 }
 0x740   :  { %v2461_v38 = vadd.f32 %v731_v36, %v723_v37 }
 0x742   :  { %739 = vrot.lane.b32.xlu1 %v2461_v38, %s2216_s25 }
 0x7b0   :  { %v738_v39 = vpop.permute.xlu0 %737 }
 0x7b1   :  { %v743_v40 = vsel %vm26_vm0, %v738_v39, 0.0 }
 0x7b2   :  { %744 = vadd.xlane.f32.xlu0 %v743_v40 }
 0x7b4   :  { %v740_v41 = vpop.permute.xlu1 %739 }
 0x7b5   :  { %v746_v43 = vsel %vm26_vm0, %v740_v41, 0.0 }
 0x7b6   :  { %747 = vadd.xlane.f32.xlu1 %v746_v43 }
 0x83f   :  { %v745_v44 = vpop.xlane.xlu0 %744 }
 0x840   :  { %v749_v45 = vmul.f32 0.03125, %v745_v44 }
 0x842   :  { %v751_v46 = vsub.f32 %v2457_v35, %v749_v45 }
 0x843   :  { %v748_v47 = vpop.xlane.xlu1 %747 }
 0x844   :  { %v750_v48 = vmul.f32 0.03125, %v748_v47  ;;  %v753_v49 = vmul.f32 %v751_v46, %v751_v46 }
 0x846   :  { %v752_v50 = vsub.f32 %v2461_v38, %v750_v48  ;;  %757 = vrot.lane.b32.xlu0 %v753_v49, %s2216_s25 }
 0x848   :  { %v754_v51 = vmul.f32 %v752_v50, %v752_v50 }
 0x84a   :  { %759 = vrot.lane.b32.xlu1 %v754_v51, %s2216_s25 }
 0x8b8   :  { %v758_v52 = vpop.permute.xlu0 %757 }
 0x8b9   :  { %v763_v55 = vsel %vm26_vm0, %v758_v52, 0.0 }
 0x8ba   :  { %764 = vadd.xlane.f32.xlu0 %v763_v55 }
 0x8bc   :  { %v760_v56 = vpop.permute.xlu1 %759 }
 0x8bd   :  { %v766_v57 = vsel %vm26_vm0, %v760_v56, 0.0 }
 0x8be   :  { %767 = vadd.xlane.f32.xlu1 %v766_v57 }
 0x8d0   :  { %782 = vrot.lane.b32.xlu0 %v2476_v58, %s2218_s15 }
 0x947   :  { %v765_v62 = vpop.xlane.xlu0 %764 }
 0x948   :  { %v769_v63 = vmul.f32 0.03125, %v765_v62 }
 0x94a   :  { %v771_v0 = vadd.f32 1e-05, %v769_v63 }
 0x94b   :  { %v768_v1 = vpop.xlane.xlu1 %767  ;;  %v783_v15 = vpop.permute.xlu0 %782 }
 0x94c   :  { %2196 = vrsqrt.f32 %v771_v0  ;;  %v770_v2 = vmul.f32 0.03125, %v768_v1  ;;  %v1760_v1 = vld [vmem:[%s2703_s2 + $0x44] ss:$0 sm:$0xff] }
 0x94e   :  { %v772_v3 = vadd.f32 1e-05, %v770_v2  ;;  %v1047_v2 = vld [vmem:[%s2704_s1 + $0xc0] sm:$0xff] }
 0x950   :  { %2198 = vrsqrt.f32 %v772_v3  ;;  %v1048_v3 = vld [vmem:[%s2704_s1 + $0xc8] sm:$0xff] }
 0x951   :  { %v2089_v5 = vpack.c.bf16 %v1048_v3, %v1047_v2 }
 0x953   :  { %2090 = vmatprep.subr.bf16.mxu1 %v2089_v5 }
 0x956   :  { %v2197_v14 = vpop.eup %2196 }
 0x957   :  { %v775_v21 = vmul.f32 %v2197_v14, %v751_v46 }
 0x959   :  { %v785_v22 = vmul.f32 %v783_v15, %v775_v21 }
 0x95a   :  { %v2199_v26 = vpop.eup %2198 }
 0x95b   :  { %v776_v27 = vmul.f32 %v2199_v26, %v752_v50  ;;  %v787_v16 = vadd.f32 %v2476_v58, %v785_v22 }
 0x95d   :  { %v786_v28 = vmul.f32 %v783_v15, %v776_v27  ;;  %800 = vrot.lane.b32.xlu1 %v787_v16, %s2216_s25 }
 0x95f   :  { %v788_v29 = vadd.f32 %v2476_v58, %v786_v28 }
 0x961   :  { %802 = vrot.lane.b32.xlu0 %v788_v29, %s2216_s25 }
 0x9cf   :  { %v801_v24 = vpop.permute.xlu1 %800 }
 0x9d0   :  { %1933 = vmatprep.mubr.msk.f32.mxu1 %vm26_vm0, %v801_v24 }
 0x9d3   :  { %v803_v30 = vpop.permute.xlu0 %802 }
 0x9d4   :  { %1934 = vmatmul.mubr.msk.f32.vlgmr.msra.gmra.mrb[10].mxu1 %vm26_vm0, %v803_v30 }
 0x9d5   :  { %2092 = vmatpush3.bf16.msra.mxu1 %v2089_v5  ;;  %v1365_v5 = vld [vmem:[%s2704_s1 + $0xf8] sm:$0xff] }
 0x9d6   :  { %2094 = vmatprep.subr.bf16.mxu1 %v2093_v7 }
 0x9d9   :  { %2096 = vmatpush3.bf16.msra.mxu1 %v2093_v7  ;;  %v2111_v7 = vpack.c.bf16 %v1365_v5, %v1364_v4  ;;  %v1615_v4 = vld [vmem:[%s2704_s1 + $0x158] sm:$0xff] }
 0xaa7   :  { %v1935_v8 = vpop.f32.mrb[10].mxu1 }
 0xaa8   :  { %v880_v25 = vadd.f32 %v1935_v8, %v2525_v34  ;;  %v874_v9 = vpop.f32.mrb[11].mxu1 }
 0xaa9   :  { %v875_v32 = vadd.f32 %v2525_v34, %v874_v9 }
 0xaaa   :  { %v884_v37 = vmax.f32 %v880_v25, 0.0 }
 0xaab   :  { %v883_v36 = vmax.f32 %v875_v32, 0.0 }
 0xaad   :  { %1952 = vmatprep.mubr.msk.f32.mxu0 %vm893_vm4, %v883_v36 }
 0xaae   :  { %1953 = vmatmul.mubr.msk.f32.vlgmr.msra.gmra.mrb[4].mxu0 %vm893_vm4, %v884_v37 }
 0xb81   :  { %v1954_v39 = vpop.f32.mrb[4].mxu0 }
 0xb82   :  { %979 = vrot.lane.b32.xlu0 %v1954_v39, %s2218_s15  ;;  %v966_v40 = vpop.f32.mrb[5].mxu0 }
 0xb83   :  { %977 = vrot.lane.b32.xlu1 %v966_v40, %s2218_s15 }
 0xb87   :  { %985 = vrot.lane.b32.xlu1 %v2476_v58, %s2216_s25 }
 0xbf4   :  { %v980_v41 = vpop.permute.xlu0 %979 }
 0xbf5   :  { %v978_v43 = vpop.permute.xlu1 %977  ;;  %v984_v44 = vadd.f32 %v980_v41, %v2461_v38 }
 0xbf6   :  { %v983_v45 = vadd.f32 %v978_v43, %v2457_v35 }
 0xbf9   :  { %v986_v46 = vpop.permute.xlu1 %985 }
 0xbfa   :  { %v2537_v47 = vadd.f32 %v986_v46, %v983_v45  ;;  %v2539_v48 = vadd.f32 %v986_v46, %v984_v44 }
 0xbfc   :  { %994 = vrot.lane.b32.xlu1 %v2539_v48, %s2216_s25  ;;  %992 = vrot.lane.b32.xlu0 %v2537_v47, %s2216_s25 }
 0xc6e   :  { %v995_v49 = vpop.permute.xlu1 %994  ;;  %v993_v50 = vpop.permute.xlu0 %992 }
 0xc6f   :  { %999 = vst.msk [vmem:[%s2705_s3 + $0x8] sm:$0xff] %vm26_vm0, %v995_v49  ;;  %998 = vst.msk [vmem:[%s2705_s3] sm:$0xff] %vm26_vm0, %v993_v50  ;;  %v1004_v35 = vsel %vm26_vm0, %v995_v49, 0.0  ;;  %v1001_v38 = vsel %vm26_vm0, %v993_v50, 0.0 }
 0xc70   :  { %1005 = vadd.xlane.f32.xlu1 %v1004_v35  ;;  %1002 = vadd.xlane.f32.xlu0 %v1001_v38 }
 0xcfd   :  { %v1006_v51 = vpop.xlane.xlu1 %1005  ;;  %v1003_v52 = vpop.xlane.xlu0 %1002 }
 0xcfe   :  { %v1008_v55 = vmul.f32 0.03125, %v1006_v51  ;;  %v1007_v56 = vmul.f32 0.03125, %v1003_v52 }
 0xd00   :  { %v1010_v57 = vsub.f32 %v2539_v48, %v1008_v55  ;;  %v1009_v58 = vsub.f32 %v2537_v47, %v1007_v56 }
 0xd02   :  { %v1012_v59 = vmul.f32 %v1010_v57, %v1010_v57  ;;  %v1011_v60 = vmul.f32 %v1009_v58, %v1009_v58 }
 0xd04   :  { %1017 = vrot.lane.b32.xlu1 %v1012_v59, %s2216_s25  ;;  %1015 = vrot.lane.b32.xlu0 %v1011_v60, %s2216_s25  ;;  %v1363_v59 = vld [vmem:[%s2704_s1 + $0xe8] sm:$0xff] }
 0xd76   :  { %v1018_v61 = vpop.permute.xlu1 %1017  ;;  %v1016_v62 = vpop.permute.xlu0 %1015 }
 0xd77   :  { %v1024_v63 = vsel %vm26_vm0, %v1018_v61, 0.0  ;;  %v1021_v0 = vsel %vm26_vm0, %v1016_v62, 0.0 }
 0xd78   :  { %1025 = vadd.xlane.f32.xlu1 %v1024_v63  ;;  %1022 = vadd.xlane.f32.xlu0 %v1021_v0 }
 0xd8e   :  { %1040 = vrot.lane.b32.xlu0 %v1760_v1, %s2218_s15 }
 0xe05   :  { %v1026_v10 = vpop.xlane.xlu1 %1025  ;;  %v1023_v11 = vpop.xlane.xlu0 %1022 }
 0xe06   :  { %v1028_v12 = vmul.f32 0.03125, %v1026_v10  ;;  %v1027_v13 = vmul.f32 0.03125, %v1023_v11 }
 0xe08   :  { %v1030_v14 = vadd.f32 1e-05, %v1028_v12  ;;  %v1029_v15 = vadd.f32 1e-05, %v1027_v13 }
 0xe09   :  { %v1041_v19 = vpop.permute.xlu0 %1040 }
 0xe0a   :  { %2200 = vrsqrt.f32 %v1030_v14 }
 0xe0b   :  { %2202 = vrsqrt.f32 %v1029_v15 }
 0xe14   :  { %v2201_v18 = vpop.eup %2200 }
 0xe15   :  { %v2203_v20 = vpop.eup %2202  ;;  %v1034_v21 = vmul.f32 %v2201_v18, %v1010_v57 }
 0xe16   :  { %v1033_v22 = vmul.f32 %v2203_v20, %v1009_v58  ;;  %v1362_v58 = vld [vmem:[%s2704_s1 + $0xe0] sm:$0xff] }
 0xe17   :  { %v1044_v23 = vmul.f32 %v1041_v19, %v1034_v21  ;;  %v2107_v63 = vpack.c.bf16 %v1363_v59, %v1362_v58 }
 0xe18   :  { %v1043_v26 = vmul.f32 %v1041_v19, %v1033_v22 }
 0xe19   :  { %v1046_v27 = vadd.f32 %v1760_v1, %v1044_v23 }
 0xe1a   :  { %v1045_v16 = vadd.f32 %v1760_v1, %v1043_v26 }
 0xe1b   :  { %1055 = vrot.lane.b32.xlu0 %v1046_v27, %s2216_s25 }
 0xe1c   :  { %1053 = vrot.lane.b32.xlu1 %v1045_v16, %s2216_s25 }
 0xe8d   :  { %v1056_v28 = vpop.permute.xlu0 %1055 }
 0xe8e   :  { %v1054_v29 = vpop.permute.xlu1 %1053 }
 0xe8f   :  { %1963 = vmatprep.mubr.msk.f32.mxu1 %vm26_vm0, %v1054_v29 }
 0xe90   :  { %1964 = vmatmul.mubr.msk.f32.vlgmr.msra.gmra.mrb[12].mxu1 %vm26_vm0, %v1056_v28 }
 0xf63   :  { %v1965_v24 = vpop.f32.mrb[12].mxu1 }
 0xf64   :  { %v1127_v30 = vpop.f32.mrb[13].mxu1 }
 0xf65   :  { %v2157_v17 = vpack.i.bf16 %v1965_v24, %v1127_v30  ;;  %1970 = vmatprep.mubr.msk.f32.mxu1 %vm26_vm0, %v1127_v30 }
 0xf67   :  { %2153 = vrot.lane.b32.xlu1 %v2157_v17, %s2216_s25 }
 0xfd9   :  { %v2154_v31 = vpop.permute.xlu1 %2153 }
 0xfda   :  { %v2156_v33 = vunpack.i.h.bf16 %v2154_v31  ;;  %v2155_v8 = vunpack.i.l.bf16 %v2154_v31 }
 0xfdc   :  { %v2097_v25 = vpack.c.bf16 %v2156_v33, %v2155_v8 }
 0xfde   :  { %2099 = vmatprep.subr.msk.bf16.mxu1 %vm2354_vm1, %v2097_v25 }
 0xfdf   :  { %2102 = vmatpush3.bf16.xpose.msk.msra.mxu1 %vm2354_vm1, %v2097_v25  ;;  %v1771_v25 = vld [vmem:[%s2703_s2 + $0x45] ss:$0 sm:$0xff] }
 0xfe6   :  { %1971 = vmatmul.mubr.msk.f32.vlgmr.msra.gmra.mrb[14].mxu1 %vm26_vm0, %v1965_v24 }
0x10b9   :  { %v1972_v9 = vpop.f32.mrb[14].mxu1 }
0x10ba   :  { %1233 = vrot.lane.b32.xlu1 %v1972_v9, %s2218_s15  ;;  %v1218_v32 = vpop.f32.mrb[15].mxu1  ;;  %v1512_v9 = vld [vmem:[%s2704_s1 + $0x100] sm:$0xff] }
0x10bb   :  { %1231 = vrot.lane.b32.xlu0 %v1218_v32, %s2218_s15  ;;  %v1513_v32 = vld [vmem:[%s2704_s1 + $0x108] sm:$0xff] }
0x112c   :  { %v1234_v36 = vpop.permute.xlu1 %1233 }
0x112d   :  { %v1238_v37 = vsel %vm359_vm2, %v1234_v36, -1e+09  ;;  %v1232_v39 = vpop.permute.xlu0 %1231  ;;  %v2115_v36 = vpack.c.bf16 %v1513_v32, %v1512_v9 }
0x112e   :  { %v1237_v40 = vsel %vm358_vm3, %v1232_v39, -1e+09  ;;  %v1243_v41 = vsel %vm1239_vm5, %v1238_v37, -inf }
0x112f   :  { %1244 = vmax.xlane.f32.xlu1 %v1243_v41  ;;  %v1240_v42 = vsel %vm1239_vm5, %v1237_v40, -inf  ;;  %2116 = vmatprep.subr.bf16.mxu1 %v2115_v36 }
0x1130   :  { %1241 = vmax.xlane.f32.xlu0 %v1240_v42  ;;  %2118 = vmatpush3.bf16.msra.mxu1 %v2115_v36 }
0x11bc   :  { %v1245_v43 = vpop.xlane.xlu1 %1244 }
0x11bd   :  { %v1247_v44 = vsub.f32 %v1238_v37, %v1245_v43  ;;  %v1242_v45 = vpop.xlane.xlu0 %1241 }
0x11be   :  { %v1246_v46 = vsub.f32 %v1237_v40, %v1242_v45  ;;  %v1515_v45 = vld [vmem:[%s2704_s1 + $0x118] sm:$0xff] }
0x11bf   :  { %v1250_v49 = vmul.f32 1.442695, %v1247_v44  ;;  %v1514_v44 = vld [vmem:[%s2704_s1 + $0x110] sm:$0xff] }
0x11c0   :  { %v1248_v50 = vmul.f32 1.442695, %v1246_v46  ;;  %v2119_v46 = vpack.c.bf16 %v1515_v45, %v1514_v44 }
0x11c1   :  { %2204 = vpow2.f32 %v1250_v49  ;;  %v1608_v49 = vld [vmem:[%s2704_s1 + $0x120] sm:$0xff] }
0x11c2   :  { %2206 = vpow2.f32 %v1248_v50  ;;  %2120 = vmatprep.subr.bf16.mxu1 %v2119_v46  ;;  %v1609_v50 = vld [vmem:[%s2704_s1 + $0x128] sm:$0xff] }
0x11c3   :  { %2122 = vmatpush3.bf16.msra.mxu1 %v2119_v46 }
0x11cb   :  { %v2205_v35 = vpop.eup %2204 }
0x11cc   :  { %v2207_v38 = vpop.eup %2206  ;;  %1256 = vrot.lane.b32.xlu1 %v2205_v35, %s2216_s25 }
0x11cd   :  { %1254 = vrot.lane.b32.xlu0 %v2207_v38, %s2216_s25 }
0x123e   :  { %v1257_v53 = vpop.permute.xlu1 %1256 }
0x123f   :  { %v1255_v54 = vpop.permute.xlu0 %1254  ;;  %v1264_v51 = vsel %vm1260_vm6, %v1257_v53, 0.0  ;;  %v2123_v53 = vpack.c.bf16 %v1609_v50, %v1608_v49 }
0x1240   :  { %1265 = vadd.xlane.f32.xlu1 %v1264_v51  ;;  %v1261_v52 = vsel %vm1260_vm6, %v1255_v54, 0.0  ;;  %v1611_v54 = vld [vmem:[%s2704_s1 + $0x138] sm:$0xff] }
0x1241   :  { %1262 = vadd.xlane.f32.xlu0 %v1261_v52 }
0x1257   :  { %2158 = vrot.lane.b32.xlu0 %v2157_v17, %s2217_s17 }
0x12cd   :  { %v1266_v55 = vpop.xlane.xlu1 %1265 }
0x12ce   :  { %2208 = vrcp.f32 %v1266_v55  ;;  %v1263_v56 = vpop.xlane.xlu0 %1262 }
0x12cf   :  { %2210 = vrcp.f32 %v1263_v56  ;;  %v1612_v56 = vld [vmem:[%s2704_s1 + $0x140] sm:$0xff] }
0x12d2   :  { %v2159_v57 = vpop.permute.xlu0 %2158 }
0x12d3   :  { %v2161_v60 = vunpack.i.h.bf16 %v2159_v57  ;;  %v2160_v61 = vunpack.i.l.bf16 %v2159_v57  ;;  %v1613_v57 = vld [vmem:[%s2704_s1 + $0x148] sm:$0xff] }
0x12d5   :  { %v2103_v62 = vpack.c.bf16 %v2161_v60, %v2160_v61  ;;  %v2131_v61 = vpack.c.bf16 %v1613_v57, %v1612_v56 }
0x12d7   :  { %2104 = vmatprep.subr.bf16.mxu0 %v2103_v62 }
0x12d8   :  { %v2209_v0 = vpop.eup %2208  ;;  %2106 = vmatpush3.bf16.msra.mxu0 %v2103_v62 }
0x12d9   :  { %v2211_v1 = vpop.eup %2210  ;;  %v1270_v2 = vmul.f32 %v2209_v0, %v2205_v35  ;;  %2108 = vmatprep.subr.bf16.mxu0 %v2107_v63  ;;  %v1610_v35 = vld [vmem:[%s2704_s1 + $0x130] sm:$0xff] }
0x12da   :  { %v1268_v3 = vmul.f32 %v2211_v1, %v2207_v38  ;;  %v2127_v55 = vpack.c.bf16 %v1611_v54, %v1610_v35 }
0x12db   :  { %1275 = vrot.lane.b32.xlu0 %v1270_v2, %s2216_s25 }
0x12dc   :  { %1273 = vrot.lane.b32.xlu1 %v1268_v3, %s2216_s25  ;;  %v1614_v3 = vld [vmem:[%s2704_s1 + $0x150] sm:$0xff] }
0x12dd   :  { %v2135_v5 = vpack.c.bf16 %v1615_v4, %v1614_v3 }
0x134d   :  { %v1276_v10 = vpop.permute.xlu0 %1275 }
0x134e   :  { %v1274_v6 = vpop.permute.xlu1 %1273 }
0x134f   :  { %1977 = vmatprep.mubr.msk.f32.mxu0 %vm1260_vm6, %v1274_v6  ;;  %v1772_v6 = vld [vmem:[%s2703_s2 + $0x46] ss:$0 sm:$0xff] }
0x1350   :  { %1978 = vmatmul.mubr.msk.f32.vlgmr.msra.gmra.mrb[6].mxu0 %vm1260_vm6, %v1276_v10 }
0x1351   :  { %2110 = vmatpush3.bf16.msra.mxu0 %v2107_v63 }
0x1352   :  { %2112 = vmatprep.subr.bf16.mxu0 %v2111_v7 }
0x1355   :  { %2114 = vmatpush3.bf16.msra.mxu0 %v2111_v7 }
0x1356   :  { %2124 = vmatprep.subr.bf16.mxu0 %v2123_v53 }
0x1423   :  { %v1979_v11 = vpop.f32.mrb[6].mxu0 }
0x1424   :  { %v1353_v12 = vpop.f32.mrb[7].mxu0 }
0x1425   :  { %1988 = vmatprep.mubr.msk.f32.mxu0 %vm26_vm0, %v1353_v12 }
0x1426   :  { %1989 = vmatmul.mubr.msk.f32.vlgmr.msra.gmra.mrb[8].mxu0 %vm26_vm0, %v1979_v11 }
0x1427   :  { %2126 = vmatpush3.bf16.msra.mxu0 %v2123_v53 }
0x1428   :  { %2128 = vmatprep.subr.bf16.mxu0 %v2127_v55 }
0x142b   :  { %2130 = vmatpush3.bf16.msra.mxu0 %v2127_v55 }
0x142c   :  { %2132 = vmatprep.subr.bf16.mxu0 %v2131_v61 }
0x142f   :  { %2134 = vmatpush3.bf16.msra.mxu0 %v2131_v61 }
0x1430   :  { %2136 = vmatprep.subr.bf16.mxu0 %v2135_v5 }
0x1433   :  { %2138 = vmatpush3.bf16.msra.mxu0 %v2135_v5 }
0x14f9   :  { %v1990_v13 = vpop.f32.mrb[8].mxu0 }
0x14fa   :  { %1451 = vrot.lane.b32.xlu0 %v1990_v13, %s2218_s15  ;;  %v1438_v14 = vpop.f32.mrb[9].mxu0 }
0x14fb   :  { %1449 = vrot.lane.b32.xlu1 %v1438_v14, %s2218_s15 }
0x156c   :  { %v1452_v15 = vpop.permute.xlu0 %1451 }
0x156d   :  { %v2620_v18 = vadd.f32 %v1452_v15, %v2539_v48  ;;  %v1450_v19 = vpop.permute.xlu1 %1449 }
0x156e   :  { %v2623_v20 = vadd.f32 %v1450_v19, %v2537_v47 }
0x156f   :  { %1462 = vrot.lane.b32.xlu0 %v2620_v18, %s2216_s25 }
0x1570   :  { %1460 = vrot.lane.b32.xlu1 %v2623_v20, %s2216_s25 }
0x15e1   :  { %v1463_v21 = vpop.permute.xlu0 %1462 }
0x15e2   :  { %v1461_v22 = vpop.permute.xlu1 %1460  ;;  %v1469_v23 = vsel %vm26_vm0, %v1463_v21, 0.0 }
0x15e3   :  { %1470 = vadd.xlane.f32.xlu0 %v1469_v23  ;;  %v1466_v26 = vsel %vm26_vm0, %v1461_v22, 0.0 }
0x15e4   :  { %1467 = vadd.xlane.f32.xlu1 %v1466_v26 }
0x1670   :  { %v1471_v48 = vpop.xlane.xlu0 %1470 }
0x1671   :  { %v1473_v27 = vmul.f32 0.03125, %v1471_v48  ;;  %v1468_v16 = vpop.xlane.xlu1 %1467 }
0x1672   :  { %v1472_v28 = vmul.f32 0.03125, %v1468_v16 }
0x1673   :  { %v1475_v47 = vsub.f32 %v2620_v18, %v1473_v27 }
0x1674   :  { %v1474_v29 = vsub.f32 %v2623_v20, %v1472_v28 }
0x1675   :  { %v1477_v24 = vmul.f32 %v1475_v47, %v1475_v47 }
0x1676   :  { %v1476_v30 = vmul.f32 %v1474_v29, %v1474_v29 }
0x1677   :  { %1482 = vrot.lane.b32.xlu1 %v1477_v24, %s2216_s25 }
0x1678   :  { %1480 = vrot.lane.b32.xlu0 %v1476_v30, %s2216_s25 }
0x16e9   :  { %v1483_v17 = vpop.permute.xlu1 %1482 }
0x16ea   :  { %v1481_v31 = vpop.permute.xlu0 %1480  ;;  %v1489_v33 = vsel %vm26_vm0, %v1483_v17, 0.0 }
0x16eb   :  { %1490 = vadd.xlane.f32.xlu0 %v1489_v33  ;;  %v1486_v8 = vsel %vm26_vm0, %v1481_v31, 0.0 }
0x16ec   :  { %1487 = vadd.xlane.f32.xlu1 %v1486_v8 }
0x1701   :  { %1505 = vrot.lane.b32.xlu0 %v1771_v25, %s2218_s15 }
0x1778   :  { %v1491_v37 = vpop.xlane.xlu0 %1490 }
0x1779   :  { %v1493_v39 = vmul.f32 0.03125, %v1491_v37  ;;  %v1488_v40 = vpop.xlane.xlu1 %1487 }
0x177a   :  { %v1492_v41 = vmul.f32 0.03125, %v1488_v40 }
0x177b   :  { %v1495_v42 = vadd.f32 1e-05, %v1493_v39 }
0x177c   :  { %v1494_v43 = vadd.f32 1e-05, %v1492_v41  ;;  %v1506_v52 = vpop.permute.xlu0 %1505 }
0x177d   :  { %2212 = vrsqrt.f32 %v1495_v42 }
0x177e   :  { %2214 = vrsqrt.f32 %v1494_v43 }
0x1787   :  { %v2213_v38 = vpop.eup %2212 }
0x1788   :  { %v2215_v51 = vpop.eup %2214  ;;  %v1499_v58 = vmul.f32 %v2213_v38, %v1475_v47 }
0x1789   :  { %v1498_v59 = vmul.f32 %v2215_v51, %v1474_v29 }
0x178a   :  { %v1509_v62 = vmul.f32 %v1506_v52, %v1499_v58 }
0x178b   :  { %v1508_v60 = vmul.f32 %v1506_v52, %v1498_v59 }
0x178c   :  { %v1511_v0 = vadd.f32 %v1771_v25, %v1509_v62 }
0x178d   :  { %v1510_v63 = vadd.f32 %v1771_v25, %v1508_v60 }
0x178f   :  { %1523 = vrot.lane.b32.xlu1 %v1510_v63, %s2216_s25 }
0x1793   :  { %1525 = vrot.lane.b32.xlu1 %v1511_v0, %s2216_s25 }
0x1801   :  { %v1524_v1 = vpop.permute.xlu1 %1523 }
0x1802   :  { %1999 = vmatprep.mubr.msk.f32.mxu1 %vm26_vm0, %v1524_v1 }
0x1805   :  { %v1526_v2 = vpop.permute.xlu1 %1525 }
0x1806   :  { %2000 = vmatmul.mubr.msk.f32.vlgmr.msra.gmra.mrb[16].mxu1 %vm26_vm0, %v1526_v2 }
0x18d9   :  { %v2001_v7 = vpop.f32.mrb[16].mxu1 }
0x18da   :  { %v1603_v10 = vadd.f32 %v2001_v7, %v1772_v6  ;;  %v1597_v11 = vpop.f32.mrb[17].mxu1 }
0x18db   :  { %v1598_v12 = vadd.f32 %v1772_v6, %v1597_v11 }
0x18dc   :  { %v1607_v14 = vmax.f32 %v1603_v10, 0.0 }
0x18dd   :  { %v1606_v13 = vmax.f32 %v1598_v12, 0.0 }
0x18df   :  { %2018 = vmatprep.mubr.msk.f32.mxu0 %vm893_vm4, %v1606_v13 }
0x18e0   :  { %2019 = vmatmul.mubr.msk.f32.vlgmr.msra.gmra.mrb[10].mxu0 %vm893_vm4, %v1607_v14 }
0x19b3   :  { %v2020_v15 = vpop.f32.mrb[10].mxu0 }
0x19b4   :  { %1701 = vrot.lane.b32.xlu1 %v2020_v15, %s2218_s15  ;;  %v1688_v19 = vpop.f32.mrb[11].mxu0 }
0x19b5   :  { %1699 = vrot.lane.b32.xlu0 %v1688_v19, %s2218_s15 }
0x19b9   :  { %1713 = vrot.lane.b32.xlu0 %v2525_v34, %s2216_s25 }
0x1a26   :  { %v1702_v21 = vpop.permute.xlu1 %1701 }
0x1a27   :  { %v1700_v22 = vpop.permute.xlu0 %1699  ;;  %v1706_v23 = vadd.f32 %v1702_v21, %v2620_v18 }
0x1a28   :  { %v1705_v26 = vadd.f32 %v1700_v22, %v2623_v20 }
0x1a2b   :  { %v1714_v48 = vpop.permute.xlu0 %1713 }
0x1a2c   :  { %v1716_v27 = vadd.f32 %v1714_v48, %v1705_v26  ;;  %v1717_v16 = vadd.f32 %v1714_v48, %v1706_v23 }
0x1a2e   :  { %1722 = vrot.lane.b32.xlu0 %v1717_v16, %s2216_s25  ;;  %1720 = vrot.lane.b32.xlu1 %v1716_v27, %s2216_s25 }
0x1aa0   :  { %v1723_v28 = vpop.permute.xlu0 %1722  ;;  %v1721_v47 = vpop.permute.xlu1 %1720 }
0x1aa1   :  { %1727 = vst.msk [vmem:[%s2705_s3 + $0x18] sm:$0xff] %vm26_vm0, %v1723_v28  ;;  %1726 = vst.msk [vmem:[%s2705_s3 + $0x10] sm:$0xff] %vm26_vm0, %v1721_v47 }

</bundles_post_ra>
